<compile_context>
chip_gen: v5e
topology: v5e:2x2
jax: 0.10.0
libtpu: 0.0.40
codegen_flags: <defaults>
</compile_context>

<pallas_src>
import functools

import jax
import jax.numpy as jnp
from jax import lax
from jax.experimental import pallas as pl
from jax.experimental.pallas import tpu as pltpu


def _attention_petl_kernel(
    x_ref,        # (N,  C)  bf16  full sequence for this batch element
    wq_ref,       # (C,  C)  bf16  folded: Wq^T * ssf_scale_q * head_dim**-0.5
    bq_ref,       # (1,  C)  f32   folded: ssf_shift_q * head_dim**-0.5
    wkv_ref,      # (C, 2C)  bf16  folded: Wkv^T * ssf_scale_kv
    bkv_ref,      # (1, 2C)  f32   folded: ssf_shift_kv
    wproj_ref,    # (C,  C)  bf16  folded: Wproj^T * ssf_scale_linear
    bproj_ref,    # (1,  C)  f32   folded: bproj*ssf_scale_lin + ssf_shift_lin
    o_ref,        # (tq, C)  output rows of this q-block
    kv_ref,       # (N, 2C)  bf16  persistent scratch: K/V cached across q-blocks
    ctx_ref,      # (tq, C)  bf16  scratch: attention output before projection
    *,
    num_heads: int,
    head_dim: int,
    tq: int,
):
    mm_dtype = wq_ref.dtype
    C = num_heads * head_dim
    qi = pl.program_id(1)

    # ---- K/V projection: only on the first q-block of each batch element ----
    @pl.when(qi == 0)
    def _():
        kv = jnp.dot(x_ref[...], wkv_ref[...],
                     preferred_element_type=jnp.float32) + bkv_ref[...]
        kv_ref[...] = kv.astype(mm_dtype)

    # ---- Q projection for this q-block (rows sliced from the resident x) ----
    q_rows = x_ref[pl.ds(pl.multiple_of(qi * tq, tq), tq), :]
    q = (jnp.dot(q_rows, wq_ref[...], preferred_element_type=jnp.float32)
         + bq_ref[...]).astype(mm_dtype)

    k = kv_ref[:, :C]
    v = kv_ref[:, C:]

    # ---- per-head attention --------------------------------------------------
    #  * static lane slices; the MXU does the K-transpose inside dot_general
    #  * deferred softmax normalization (scale the (tq, hd) context, not the
    #    (tq, N) probabilities; f32 rowsum is taken before the bf16 cast)
    #  * heads grouped so ctx stores are lane-dense (>=128 lanes or full C)
    hg = min(num_heads, max(1, 128 // head_dim))
    while num_heads % hg:
        hg -= 1
    # TODO(synk): for very long sequences (N >~ 2-4K, v7x first) switch this to
    # a flash-style online-softmax loop over K/V tiles instead of materializing
    # (tq, N) f32 logits against a fully resident K/V.
    for g in range(num_heads // hg):
        parts = []
        for hh in range(hg):
            h = g * hg + hh
            hs = slice(h * head_dim, (h + 1) * head_dim)
            logits = lax.dot_general(                 # (tq, N) = q_h @ k_h^T
                q[:, hs], k[:, hs],
                (((1,), (1,)), ((), ())),
                preferred_element_type=jnp.float32)
            logits = logits - jnp.max(logits, axis=-1, keepdims=True)
            p = jnp.exp(logits)                                   # f32, in [0,1]
            denom = jnp.sum(p, axis=-1, keepdims=True)            # f32 rowsum
            ctx_h = jnp.dot(p.astype(mm_dtype), v[:, hs],
                            preferred_element_type=jnp.float32)   # (tq, hd)
            ctx_h = ctx_h * pl.reciprocal(denom, approx=True)
            parts.append(ctx_h.astype(mm_dtype))
        gs = slice(g * hg * head_dim, (g + 1) * hg * head_dim)
        ctx_ref[:, gs] = parts[0] if hg == 1 else jnp.concatenate(parts, axis=-1)

    # ---- output projection (SSF folded into weight / bias) -------------------
    out = jnp.dot(ctx_ref[...], wproj_ref[...],
                  preferred_element_type=jnp.float32) + bproj_ref[...]
    o_ref[...] = out.astype(o_ref.dtype)


def fold_params(wqkv, wproj, bproj,
                ssf_scale_qkv, ssf_shift_qkv,
                ssf_scale_linear, ssf_shift_linear,
                *, num_heads, compute_dtype=jnp.bfloat16):
    """One-time host-side prep: fold SSF and the attention scale into weights.

    wqkv : (3C, C)   nn.Linear(dim, 3*dim, bias=False).weight
    wproj: (C, C)    nn.Linear(dim, dim).weight
    bproj: (C,)      nn.Linear(dim, dim).bias

    Only the ssf / no-LoRA / no-FacT / no-VQT / no-qk_norm config is supported.
    """
    _, C = wqkv.shape
    head_dim = C // num_heads
    scale = head_dim ** (-0.5)
    f32 = jnp.float32

    # The 3C output columns are laid out [q | k | v] (matches the
    # reshape(B,N,3,H,hd) in the PyTorch module); only the q columns get the
    # 1/sqrt(head_dim) factor.
    col_scale = jnp.concatenate(
        [jnp.full((C,), scale, f32), jnp.ones((2 * C,), f32)])
    sc_qkv = ssf_scale_qkv.astype(f32) * col_scale
    sh_qkv = ssf_shift_qkv.astype(f32) * col_scale

    wqkv_f = wqkv.T.astype(f32) * sc_qkv[None, :]             # (C, 3C)
    return {
        "wq":    wqkv_f[:, :C].astype(compute_dtype),          # (C, C)
        "bq":    sh_qkv[:C].reshape(1, C),                     # f32
        "wkv":   wqkv_f[:, C:].astype(compute_dtype),          # (C, 2C)
        "bkv":   sh_qkv[C:].reshape(1, 2 * C),                 # f32
        "wproj": (wproj.T.astype(f32)
                  * ssf_scale_linear.astype(f32)[None, :]).astype(compute_dtype),
        "bproj": (bproj.astype(f32) * ssf_scale_linear.astype(f32)
                  + ssf_shift_linear.astype(f32)).reshape(1, C),
    }


def attention_petl(x, folded, *, num_heads, compute_dtype=jnp.bfloat16,
                   out_dtype=None):
    """x: (B, N, C).  folded: output of fold_params().

    out_dtype: defaults to x.dtype; pass jnp.bfloat16 if the downstream layer
    accepts it (halves output writeback bytes).
    """
    B, N, C = x.shape
    head_dim = C // num_heads
    out_dtype = x.dtype if out_dtype is None else out_dtype

    # ---- q-block size: generation-aware preference + divisibility ----------
    try:
        kind = jax.devices()[0].device_kind.lower()
    except Exception:
        kind = ""
    tq_pref = 128 if "v5" in kind else 256      # v5e MXU is 128x128

    if N > tq_pref and N % tq_pref == 0:
        tq = tq_pref
    elif N > 128 and N % 128 == 0:
        tq = 128
    else:
        tq = N          # small / ragged sequences (e.g. ViT N=197): one block
    nq = N // tq
    # Megacore: ensure >=2 grid programs so both v7x TensorCores get work even
    # for a single-image, single-block call.
    if B * nq == 1 and N % 16 == 0:
        tq = N // 2
        nq = 2
    # TODO(synk): pad the query-row axis (keys stay at true N) when B==1 and N
    # is not 16-divisible (e.g. ViT N=197) so v7x's second core is not idle.

    # ---- vmem limit: per-generation instead of a hard-coded 64 MiB ---------
    try:
        vmem_cap = pltpu.get_tpu_info().vmem_capacity_bytes
    except Exception:
        vmem_cap = 64 * 1024 * 1024
    vmem_limit = min(int(vmem_cap * 0.85), 112 * 1024 * 1024)

    kernel = functools.partial(
        _attention_petl_kernel, num_heads=num_heads, head_dim=head_dim, tq=tq)
    x_c = x.astype(compute_dtype)

    def build(single_buffer_weights):
        # Constant-index weights/biases are DMA'd once -> single VMEM buffer.
        wkw = ({"pipeline_mode": pl.Buffered(1)}
               if single_buffer_weights else {})
        const2d = lambda shp: pl.BlockSpec(shp, lambda b, qi: (0, 0), **wkw)
        return pl.pallas_call(
            kernel,
            out_shape=jax.ShapeDtypeStruct((B, N, C), out_dtype),
            grid_spec=pltpu.PrefetchScalarGridSpec(
                num_scalar_prefetch=0,
                grid=(B, nq),
                in_specs=[
                    pl.BlockSpec((None, N, C), lambda b, qi: (b, 0, 0)),  # x
                    const2d((C, C)),        # wq    (folded, bf16)
                    const2d((1, C)),        # bq    (f32)
                    const2d((C, 2 * C)),    # wkv   (folded, bf16)
                    const2d((1, 2 * C)),    # bkv   (f32)
                    const2d((C, C)),        # wproj (folded, bf16)
                    const2d((1, C)),        # bproj (folded, f32)
                ],
                out_specs=pl.BlockSpec((None, tq, C), lambda b, qi: (b, qi, 0)),
                scratch_shapes=[
                    pltpu.VMEM((N, 2 * C), compute_dtype),   # cached K/V
                    pltpu.VMEM((tq, C), compute_dtype),      # ctx (pre-proj)
                ],
            ),
            compiler_params=pltpu.CompilerParams(
                # qi must be 'arbitrary': the K/V cached at qi==0 is reused by
                # the following q-blocks; the batch axis is megacore-parallel.
                dimension_semantics=("parallel", "arbitrary"),
                vmem_limit_bytes=vmem_limit,
            ),
        )

    args = (x_c,
            folded["wq"], folded["bq"],
            folded["wkv"], folded["bkv"],
            folded["wproj"], folded["bproj"])
    try:
        return build(True)(*args)
    except Exception:
        # Fallback for JAX builds that reject single-buffered constant blocks.
        return build(False)(*args)


def _reference(x, raw, *, num_heads):
    """Pure-JAX f32 reference of the original (un-folded) module math."""
    B, N, C = x.shape
    hd = C // num_heads
    scale = hd ** (-0.5)

    qkv = x @ raw["wqkv"].T
    qkv = qkv * raw["ssf_scale_qkv"] + raw["ssf_shift_qkv"]
    qkv = qkv.reshape(B, N, 3, num_heads, hd).transpose(2, 0, 3, 1, 4)
    q, k, v = qkv[0], qkv[1], qkv[2]                      # (B, H, N, hd)

    attn = (q * scale) @ jnp.swapaxes(k, -2, -1)          # (B, H, N, N)
    attn = jax.nn.softmax(attn, axis=-1)
    ctx = jnp.swapaxes(attn @ v, 1, 2).reshape(B, N, C)

    proj = ctx @ raw["wproj"].T + raw["bproj"]
    return proj * raw["ssf_scale_linear"] + raw["ssf_shift_linear"]


if __name__ == "__main__":
    B, N, C = 2, 8, 32
    num_heads = 4

    key = jax.random.PRNGKey(0)
    keys = jax.random.split(key, 8)

    x = jax.random.normal(keys[0], (B, N, C), dtype=jnp.float32)

    # nn.Linear(dim, 3*dim, bias=False) weight is (3C, C).
    wqkv = jax.random.normal(keys[1], (3 * C, C), dtype=jnp.float32) * 0.02
    # nn.Linear(dim, dim) weight (C, C) with bias (C,).
    wproj = jax.random.normal(keys[2], (C, C), dtype=jnp.float32) * 0.02
    bproj = jax.random.normal(keys[3], (C,), dtype=jnp.float32) * 0.02

    # init_ssf_scale_shift: scale ~ N(1, 0.02), shift ~ N(0, 0.02)
    ssf_scale_qkv = 1.0 + 0.02 * jax.random.normal(keys[4], (3 * C,), jnp.float32)
    ssf_shift_qkv = 0.02 * jax.random.normal(keys[5], (3 * C,), jnp.float32)
    ssf_scale_lin = 1.0 + 0.02 * jax.random.normal(keys[6], (C,), jnp.float32)
    ssf_shift_lin = 0.02 * jax.random.normal(keys[7], (C,), jnp.float32)

    raw = {
        "wqkv": wqkv, "wproj": wproj, "bproj": bproj,
        "ssf_scale_qkv": ssf_scale_qkv, "ssf_shift_qkv": ssf_shift_qkv,
        "ssf_scale_linear": ssf_scale_lin, "ssf_shift_linear": ssf_shift_lin,
    }
    folded = fold_params(
        wqkv, wproj, bproj,
        ssf_scale_qkv, ssf_shift_qkv, ssf_scale_lin, ssf_shift_lin,
        num_heads=num_heads)

    out = attention_petl(x, folded, num_heads=num_heads)
    out = jax.block_until_ready(out)

    ref = _reference(x, raw, num_heads=num_heads)
    assert out.shape == (B, N, C)
    max_err = float(jnp.max(jnp.abs(out - ref)))
    # bf16 matmul inputs + approx softmax reciprocal -> loosened tolerance.
    assert jnp.allclose(out, ref, atol=1e-2, rtol=1e-2), max_err
    print("KERNEL_OK")
</pallas_src>

<mosaic_0001>
module attributes {stable_mosaic.version = 11 : i64} {
  func.func @_attention_petl_kernel(%arg0: i32, %arg1: i32, %arg2: memref<1x8x32xbf16, #tpu.memory_space<vmem>>, %arg3: memref<32x32xbf16, #tpu.memory_space<vmem>>, %arg4: memref<1x32xf32, #tpu.memory_space<vmem>>, %arg5: memref<32x64xbf16, #tpu.memory_space<vmem>>, %arg6: memref<1x64xf32, #tpu.memory_space<vmem>>, %arg7: memref<32x32xbf16, #tpu.memory_space<vmem>>, %arg8: memref<1x32xf32, #tpu.memory_space<vmem>>, %arg9: memref<1x8x32xf32, #tpu.memory_space<vmem>>, %arg10: memref<8x64xbf16, #tpu.memory_space<vmem>>, %arg11: memref<8x32xbf16, #tpu.memory_space<vmem>>) attributes {dimension_semantics = [#tpu.dimension_semantics<parallel>, #tpu.dimension_semantics<arbitrary>], iteration_bounds = array<i64: 2, 1>, scalar_prefetch = 0 : i64, scratch_operands = 2 : i64, tpu.core_type = #tpu.core_type<tc>, window_params = [{transform_indices = @transform_0, window_bounds = array<i64: 1, 8, 32>}, {pipeline_mode = #tpu.pipeline_mode<synchronous>, transform_indices = @transform_1, window_bounds = array<i64: 32, 32>}, {pipeline_mode = #tpu.pipeline_mode<synchronous>, transform_indices = @transform_2, window_bounds = array<i64: 1, 32>}, {pipeline_mode = #tpu.pipeline_mode<synchronous>, transform_indices = @transform_3, window_bounds = array<i64: 32, 64>}, {pipeline_mode = #tpu.pipeline_mode<synchronous>, transform_indices = @transform_4, window_bounds = array<i64: 1, 64>}, {pipeline_mode = #tpu.pipeline_mode<synchronous>, transform_indices = @transform_5, window_bounds = array<i64: 32, 32>}, {pipeline_mode = #tpu.pipeline_mode<synchronous>, transform_indices = @transform_6, window_bounds = array<i64: 1, 32>}, {transform_indices = @transform_7, window_bounds = array<i64: 1, 8, 32>}]} {
    %c0_i32 = arith.constant 0 : i32
    %0 = arith.cmpi eq, %arg1, %c0_i32 : i32
    %1 = arith.extui %0 : i1 to i32
    %c0_i32_0 = arith.constant 0 : i32
    %2 = arith.cmpi ne, %1, %c0_i32_0 : i32
    scf.if %2 {
      %c0_37 = arith.constant 0 : index
      %c0_38 = arith.constant 0 : index
      %c0_39 = arith.constant 0 : index
      %95 = vector.load %arg2[%c0_37, %c0_38, %c0_39] : memref<1x8x32xbf16, #tpu.memory_space<vmem>>, vector<1x8x32xbf16>
      %96 = vector.shape_cast %95 : vector<1x8x32xbf16> to vector<8x32xbf16>
      %c0_40 = arith.constant 0 : index
      %c0_41 = arith.constant 0 : index
      %97 = vector.load %arg5[%c0_40, %c0_41] : memref<32x64xbf16, #tpu.memory_space<vmem>>, vector<32x64xbf16>
      %cst_42 = arith.constant dense<0.000000e+00> : vector<8x64xf32>
      %98 = tpu.matmul %96, %97, %cst_42 {dimension_numbers = #tpu.dot_dimension_numbers<[1], [0], [0], [1], [0, 0, 1, 1], [], []>} : vector<8x32xbf16>, vector<32x64xbf16>, vector<8x64xf32> -> vector<8x64xf32>
      %c0_43 = arith.constant 0 : index
      %c0_44 = arith.constant 0 : index
      %99 = vector.load %arg6[%c0_43, %c0_44] : memref<1x64xf32, #tpu.memory_space<vmem>>, vector<1x64xf32>
      %100 = vector.broadcast %99 : vector<1x64xf32> to vector<8x64xf32>
      %101 = arith.addf %98, %100 : vector<8x64xf32>
      %102 = arith.truncf %101 : vector<8x64xf32> to vector<8x64xbf16>
      %c0_45 = arith.constant 0 : index
      %c0_46 = arith.constant 0 : index
      %103 = vector.load %arg10[%c0_45, %c0_46] : memref<8x64xbf16, #tpu.memory_space<vmem>>, vector<8x64xbf16>
      tpu.vector_store %arg10[%c0_45, %c0_46], %102 {strides = array<i32>} : memref<8x64xbf16, #tpu.memory_space<vmem>>, vector<8x64xbf16>,
    } else {
    }
    %c8_i32 = arith.constant 8 : i32
    %3 = arith.muli %arg1, %c8_i32 : i32
    %4 = tpu.assume_multiple %3, 8 : i32
    %c0 = arith.constant 0 : index
    %5 = arith.index_cast %4 : i32 to index
    %c0_1 = arith.constant 0 : index
    %6 = vector.load %arg2[%c0, %5, %c0_1] : memref<1x8x32xbf16, #tpu.memory_space<vmem>>, vector<1x8x32xbf16>
    %7 = vector.shape_cast %6 : vector<1x8x32xbf16> to vector<8x32xbf16>
    %c0_2 = arith.constant 0 : index
    %c0_3 = arith.constant 0 : index
    %8 = vector.load %arg3[%c0_2, %c0_3] : memref<32x32xbf16, #tpu.memory_space<vmem>>, vector<32x32xbf16>
    %cst = arith.constant dense<0.000000e+00> : vector<8x32xf32>
    %9 = tpu.matmul %7, %8, %cst {dimension_numbers = #tpu.dot_dimension_numbers<[1], [0], [0], [1], [0, 0, 1, 1], [], []>} : vector<8x32xbf16>, vector<32x32xbf16>, vector<8x32xf32> -> vector<8x32xf32>
    %c0_4 = arith.constant 0 : index
    %c0_5 = arith.constant 0 : index
    %10 = vector.load %arg4[%c0_4, %c0_5] : memref<1x32xf32, #tpu.memory_space<vmem>>, vector<1x32xf32>
    %11 = vector.broadcast %10 : vector<1x32xf32> to vector<8x32xf32>
    %12 = arith.addf %9, %11 : vector<8x32xf32>
    %13 = arith.truncf %12 : vector<8x32xf32> to vector<8x32xbf16>
    %c0_6 = arith.constant 0 : index
    %c0_7 = arith.constant 0 : index
    %14 = vector.load %arg10[%c0_6, %c0_7] : memref<8x64xbf16, #tpu.memory_space<vmem>>, vector<8x32xbf16>
    %c0_8 = arith.constant 0 : index
    %c32 = arith.constant 32 : index
    %15 = vector.load %arg10[%c0_8, %c32] : memref<8x64xbf16, #tpu.memory_space<vmem>>, vector<8x32xbf16>
    %16 = vector.extract_strided_slice %13 {offsets = [0, 0], sizes = [8, 8], strides = [1, 1]} : vector<8x32xbf16> to vector<8x8xbf16>
    %17 = vector.extract_strided_slice %14 {offsets = [0, 0], sizes = [8, 8], strides = [1, 1]} : vector<8x32xbf16> to vector<8x8xbf16>
    %cst_9 = arith.constant dense<0.000000e+00> : vector<8x8xf32>
    %18 = tpu.matmul %16, %17, %cst_9 {dimension_numbers = #tpu.dot_dimension_numbers<[1], [1], [0], [0], [0, 0, 1, 0], [], []>} : vector<8x8xbf16>, vector<8x8xbf16>, vector<8x8xf32> -> vector<8x8xf32>
    %cst_10 = arith.constant dense<0xFF800000> : vector<8xf32>
    %19 = vector.multi_reduction <maximumf>, %18, %cst_10 [1] : vector<8x8xf32> to vector<8xf32>
    %20 = vector.shape_cast %19 : vector<8xf32> to vector<8x1xf32>
    %21 = vector.broadcast %20 : vector<8x1xf32> to vector<8x8xf32>
    %22 = arith.subf %18, %21 : vector<8x8xf32>
    %23 = math.exp %22 : vector<8x8xf32>
    %cst_11 = arith.constant dense<0.000000e+00> : vector<8xf32>
    %24 = vector.multi_reduction <add>, %23, %cst_11 [1] : vector<8x8xf32> to vector<8xf32>
    %25 = vector.shape_cast %24 : vector<8xf32> to vector<8x1xf32>
    %26 = arith.truncf %23 : vector<8x8xf32> to vector<8x8xbf16>
    %27 = vector.extract_strided_slice %15 {offsets = [0, 0], sizes = [8, 8], strides = [1, 1]} : vector<8x32xbf16> to vector<8x8xbf16>
    %cst_12 = arith.constant dense<0.000000e+00> : vector<8x8xf32>
    %28 = tpu.matmul %26, %27, %cst_12 {dimension_numbers = #tpu.dot_dimension_numbers<[1], [0], [0], [1], [0, 0, 1, 1], [], []>} : vector<8x8xbf16>, vector<8x8xbf16>, vector<8x8xf32> -> vector<8x8xf32>
    %29 = tpu.reciprocal %25 {approx = true} : vector<8x1xf32> -> vector<8x1xf32>
    %30 = vector.broadcast %29 : vector<8x1xf32> to vector<8x8xf32>
    %31 = arith.mulf %28, %30 : vector<8x8xf32>
    %32 = arith.truncf %31 : vector<8x8xf32> to vector<8x8xbf16>
    %33 = vector.extract_strided_slice %13 {offsets = [0, 8], sizes = [8, 8], strides = [1, 1]} : vector<8x32xbf16> to vector<8x8xbf16>
    %34 = vector.extract_strided_slice %14 {offsets = [0, 8], sizes = [8, 8], strides = [1, 1]} : vector<8x32xbf16> to vector<8x8xbf16>
    %cst_13 = arith.constant dense<0.000000e+00> : vector<8x8xf32>
    %35 = tpu.matmul %33, %34, %cst_13 {dimension_numbers = #tpu.dot_dimension_numbers<[1], [1], [0], [0], [0, 0, 1, 0], [], []>} : vector<8x8xbf16>, vector<8x8xbf16>, vector<8x8xf32> -> vector<8x8xf32>
    %cst_14 = arith.constant dense<0xFF800000> : vector<8xf32>
    %36 = vector.multi_reduction <maximumf>, %35, %cst_14 [1] : vector<8x8xf32> to vector<8xf32>
    %37 = vector.shape_cast %36 : vector<8xf32> to vector<8x1xf32>
    %38 = vector.broadcast %37 : vector<8x1xf32> to vector<8x8xf32>
    %39 = arith.subf %35, %38 : vector<8x8xf32>
    %40 = math.exp %39 : vector<8x8xf32>
    %cst_15 = arith.constant dense<0.000000e+00> : vector<8xf32>
    %41 = vector.multi_reduction <add>, %40, %cst_15 [1] : vector<8x8xf32> to vector<8xf32>
    %42 = vector.shape_cast %41 : vector<8xf32> to vector<8x1xf32>
    %43 = arith.truncf %40 : vector<8x8xf32> to vector<8x8xbf16>
    %44 = vector.extract_strided_slice %15 {offsets = [0, 8], sizes = [8, 8], strides = [1, 1]} : vector<8x32xbf16> to vector<8x8xbf16>
    %cst_16 = arith.constant dense<0.000000e+00> : vector<8x8xf32>
    %45 = tpu.matmul %43, %44, %cst_16 {dimension_numbers = #tpu.dot_dimension_numbers<[1], [0], [0], [1], [0, 0, 1, 1], [], []>} : vector<8x8xbf16>, vector<8x8xbf16>, vector<8x8xf32> -> vector<8x8xf32>
    %46 = tpu.reciprocal %42 {approx = true} : vector<8x1xf32> -> vector<8x1xf32>
    %47 = vector.broadcast %46 : vector<8x1xf32> to vector<8x8xf32>
    %48 = arith.mulf %45, %47 : vector<8x8xf32>
    %49 = arith.truncf %48 : vector<8x8xf32> to vector<8x8xbf16>
    %50 = vector.extract_strided_slice %13 {offsets = [0, 16], sizes = [8, 8], strides = [1, 1]} : vector<8x32xbf16> to vector<8x8xbf16>
    %51 = vector.extract_strided_slice %14 {offsets = [0, 16], sizes = [8, 8], strides = [1, 1]} : vector<8x32xbf16> to vector<8x8xbf16>
    %cst_17 = arith.constant dense<0.000000e+00> : vector<8x8xf32>
    %52 = tpu.matmul %50, %51, %cst_17 {dimension_numbers = #tpu.dot_dimension_numbers<[1], [1], [0], [0], [0, 0, 1, 0], [], []>} : vector<8x8xbf16>, vector<8x8xbf16>, vector<8x8xf32> -> vector<8x8xf32>
    %cst_18 = arith.constant dense<0xFF800000> : vector<8xf32>
    %53 = vector.multi_reduction <maximumf>, %52, %cst_18 [1] : vector<8x8xf32> to vector<8xf32>
    %54 = vector.shape_cast %53 : vector<8xf32> to vector<8x1xf32>
    %55 = vector.broadcast %54 : vector<8x1xf32> to vector<8x8xf32>
    %56 = arith.subf %52, %55 : vector<8x8xf32>
    %57 = math.exp %56 : vector<8x8xf32>
    %cst_19 = arith.constant dense<0.000000e+00> : vector<8xf32>
    %58 = vector.multi_reduction <add>, %57, %cst_19 [1] : vector<8x8xf32> to vector<8xf32>
    %59 = vector.shape_cast %58 : vector<8xf32> to vector<8x1xf32>
    %60 = arith.truncf %57 : vector<8x8xf32> to vector<8x8xbf16>
    %61 = vector.extract_strided_slice %15 {offsets = [0, 16], sizes = [8, 8], strides = [1, 1]} : vector<8x32xbf16> to vector<8x8xbf16>
    %cst_20 = arith.constant dense<0.000000e+00> : vector<8x8xf32>
    %62 = tpu.matmul %60, %61, %cst_20 {dimension_numbers = #tpu.dot_dimension_numbers<[1], [0], [0], [1], [0, 0, 1, 1], [], []>} : vector<8x8xbf16>, vector<8x8xbf16>, vector<8x8xf32> -> vector<8x8xf32>
    %63 = tpu.reciprocal %59 {approx = true} : vector<8x1xf32> -> vector<8x1xf32>
    %64 = vector.broadcast %63 : vector<8x1xf32> to vector<8x8xf32>
    %65 = arith.mulf %62, %64 : vector<8x8xf32>
    %66 = arith.truncf %65 : vector<8x8xf32> to vector<8x8xbf16>
    %67 = vector.extract_strided_slice %13 {offsets = [0, 24], sizes = [8, 8], strides = [1, 1]} : vector<8x32xbf16> to vector<8x8xbf16>
    %68 = vector.extract_strided_slice %14 {offsets = [0, 24], sizes = [8, 8], strides = [1, 1]} : vector<8x32xbf16> to vector<8x8xbf16>
    %cst_21 = arith.constant dense<0.000000e+00> : vector<8x8xf32>
    %69 = tpu.matmul %67, %68, %cst_21 {dimension_numbers = #tpu.dot_dimension_numbers<[1], [1], [0], [0], [0, 0, 1, 0], [], []>} : vector<8x8xbf16>, vector<8x8xbf16>, vector<8x8xf32> -> vector<8x8xf32>
    %cst_22 = arith.constant dense<0xFF800000> : vector<8xf32>
    %70 = vector.multi_reduction <maximumf>, %69, %cst_22 [1] : vector<8x8xf32> to vector<8xf32>
    %71 = vector.shape_cast %70 : vector<8xf32> to vector<8x1xf32>
    %72 = vector.broadcast %71 : vector<8x1xf32> to vector<8x8xf32>
    %73 = arith.subf %69, %72 : vector<8x8xf32>
    %74 = math.exp %73 : vector<8x8xf32>
    %cst_23 = arith.constant dense<0.000000e+00> : vector<8xf32>
    %75 = vector.multi_reduction <add>, %74, %cst_23 [1] : vector<8x8xf32> to vector<8xf32>
    %76 = vector.shape_cast %75 : vector<8xf32> to vector<8x1xf32>
    %77 = arith.truncf %74 : vector<8x8xf32> to vector<8x8xbf16>
    %78 = vector.extract_strided_slice %15 {offsets = [0, 24], sizes = [8, 8], strides = [1, 1]} : vector<8x32xbf16> to vector<8x8xbf16>
    %cst_24 = arith.constant dense<0.000000e+00> : vector<8x8xf32>
    %79 = tpu.matmul %77, %78, %cst_24 {dimension_numbers = #tpu.dot_dimension_numbers<[1], [0], [0], [1], [0, 0, 1, 1], [], []>} : vector<8x8xbf16>, vector<8x8xbf16>, vector<8x8xf32> -> vector<8x8xf32>
    %80 = tpu.reciprocal %76 {approx = true} : vector<8x1xf32> -> vector<8x1xf32>
    %81 = vector.broadcast %80 : vector<8x1xf32> to vector<8x8xf32>
    %82 = arith.mulf %79, %81 : vector<8x8xf32>
    %83 = arith.truncf %82 : vector<8x8xf32> to vector<8x8xbf16>
    %84 = tpu.concatenate %32, %49, %66, %83 in 1 : vector<8x8xbf16>, vector<8x8xbf16>, vector<8x8xbf16>, vector<8x8xbf16> -> vector<8x32xbf16>
    %c0_25 = arith.constant 0 : index
    %c0_26 = arith.constant 0 : index
    %85 = vector.load %arg11[%c0_25, %c0_26] : memref<8x32xbf16, #tpu.memory_space<vmem>>, vector<8x32xbf16>
    tpu.vector_store %arg11[%c0_25, %c0_26], %84 {strides = array<i32>} : memref<8x32xbf16, #tpu.memory_space<vmem>>, vector<8x32xbf16>,
    %c0_27 = arith.constant 0 : index
    %c0_28 = arith.constant 0 : index
    %86 = vector.load %arg11[%c0_27, %c0_28] : memref<8x32xbf16, #tpu.memory_space<vmem>>, vector<8x32xbf16>
    %c0_29 = arith.constant 0 : index
    %c0_30 = arith.constant 0 : index
    %87 = vector.load %arg7[%c0_29, %c0_30] : memref<32x32xbf16, #tpu.memory_space<vmem>>, vector<32x32xbf16>
    %cst_31 = arith.constant dense<0.000000e+00> : vector<8x32xf32>
    %88 = tpu.matmul %86, %87, %cst_31 {dimension_numbers = #tpu.dot_dimension_numbers<[1], [0], [0], [1], [0, 0, 1, 1], [], []>} : vector<8x32xbf16>, vector<32x32xbf16>, vector<8x32xf32> -> vector<8x32xf32>
    %c0_32 = arith.constant 0 : index
    %c0_33 = arith.constant 0 : index
    %89 = vector.load %arg8[%c0_32, %c0_33] : memref<1x32xf32, #tpu.memory_space<vmem>>, vector<1x32xf32>
    %90 = vector.broadcast %89 : vector<1x32xf32> to vector<8x32xf32>
    %91 = arith.addf %88, %90 : vector<8x32xf32>
    %c0_34 = arith.constant 0 : index
    %c0_35 = arith.constant 0 : index
    %c0_36 = arith.constant 0 : index
    %92 = vector.load %arg9[%c0_34, %c0_35, %c0_36] : memref<1x8x32xf32, #tpu.memory_space<vmem>>, vector<1x8x32xf32>
    %93 = vector.shape_cast %92 : vector<1x8x32xf32> to vector<8x32xf32>
    %94 = vector.shape_cast %91 : vector<8x32xf32> to vector<1x8x32xf32>
    tpu.vector_store %arg9[%c0_34, %c0_35, %c0_36], %94 {strides = array<i32>} : memref<1x8x32xf32, #tpu.memory_space<vmem>>, vector<1x8x32xf32>,
    return
  }
  func.func @transform_0(%arg0: i32, %arg1: i32) -> (i32, i32, i32) {
    %c0_i32 = arith.constant 0 : i32
    %c0_i32_0 = arith.constant 0 : i32
    %c0_i32_1 = arith.constant 0 : i32
    return %arg0, %c0_i32, %c0_i32_0 : i32, i32, i32
  }
  func.func @transform_1(%arg0: i32, %arg1: i32) -> (i32, i32) {
    %c0_i32 = arith.constant 0 : i32
    %c0_i32_0 = arith.constant 0 : i32
    %c0_i32_1 = arith.constant 0 : i32
    return %c0_i32, %c0_i32_0 : i32, i32
  }
  func.func @transform_2(%arg0: i32, %arg1: i32) -> (i32, i32) {
    %c0_i32 = arith.constant 0 : i32
    %c0_i32_0 = arith.constant 0 : i32
    %c0_i32_1 = arith.constant 0 : i32
    return %c0_i32, %c0_i32_0 : i32, i32
  }
  func.func @transform_3(%arg0: i32, %arg1: i32) -> (i32, i32) {
    %c0_i32 = arith.constant 0 : i32
    %c0_i32_0 = arith.constant 0 : i32
    %c0_i32_1 = arith.constant 0 : i32
    return %c0_i32, %c0_i32_0 : i32, i32
  }
  func.func @transform_4(%arg0: i32, %arg1: i32) -> (i32, i32) {
    %c0_i32 = arith.constant 0 : i32
    %c0_i32_0 = arith.constant 0 : i32
    %c0_i32_1 = arith.constant 0 : i32
    return %c0_i32, %c0_i32_0 : i32, i32
  }
  func.func @transform_5(%arg0: i32, %arg1: i32) -> (i32, i32) {
    %c0_i32 = arith.constant 0 : i32
    %c0_i32_0 = arith.constant 0 : i32
    %c0_i32_1 = arith.constant 0 : i32
    return %c0_i32, %c0_i32_0 : i32, i32
  }
  func.func @transform_6(%arg0: i32, %arg1: i32) -> (i32, i32) {
    %c0_i32 = arith.constant 0 : i32
    %c0_i32_0 = arith.constant 0 : i32
    %c0_i32_1 = arith.constant 0 : i32
    return %c0_i32, %c0_i32_0 : i32, i32
  }
  func.func @transform_7(%arg0: i32, %arg1: i32) -> (i32, i32, i32) {
    %c0_i32 = arith.constant 0 : i32
    %c0_i32_0 = arith.constant 0 : i32
    return %arg0, %arg1, %c0_i32 : i32, i32, i32
  }
}

module attributes {stable_mosaic.version = 11 : i64} {
  func.func @_attention_petl_kernel(%arg0: i32, %arg1: i32, %arg2: memref<1x8x32xbf16, #tpu.memory_space<vmem>>, %arg3: memref<32x32xbf16, #tpu.memory_space<vmem>>, %arg4: memref<1x32xf32, #tpu.memory_space<vmem>>, %arg5: memref<32x64xbf16, #tpu.memory_space<vmem>>, %arg6: memref<1x64xf32, #tpu.memory_space<vmem>>, %arg7: memref<32x32xbf16, #tpu.memory_space<vmem>>, %arg8: memref<1x32xf32, #tpu.memory_space<vmem>>, %arg9: memref<1x8x32xf32, #tpu.memory_space<vmem>>, %arg10: memref<8x64xbf16, #tpu.memory_space<vmem>>, %arg11: memref<8x32xbf16, #tpu.memory_space<vmem>>) attributes {dimension_semantics = [#tpu.dimension_semantics<parallel>, #tpu.dimension_semantics<arbitrary>], iteration_bounds = array<i64: 2, 1>, scalar_prefetch = 0 : i64, scratch_operands = 2 : i64, tpu.core_type = #tpu.core_type<tc>, window_params = [{transform_indices = @transform_0, window_bounds = array<i64: 1, 8, 32>}, {pipeline_mode = #tpu.pipeline_mode<synchronous>, transform_indices = @transform_1, window_bounds = array<i64: 32, 32>}, {pipeline_mode = #tpu.pipeline_mode<synchronous>, transform_indices = @transform_2, window_bounds = array<i64: 1, 32>}, {pipeline_mode = #tpu.pipeline_mode<synchronous>, transform_indices = @transform_3, window_bounds = array<i64: 32, 64>}, {pipeline_mode = #tpu.pipeline_mode<synchronous>, transform_indices = @transform_4, window_bounds = array<i64: 1, 64>}, {pipeline_mode = #tpu.pipeline_mode<synchronous>, transform_indices = @transform_5, window_bounds = array<i64: 32, 32>}, {pipeline_mode = #tpu.pipeline_mode<synchronous>, transform_indices = @transform_6, window_bounds = array<i64: 1, 32>}, {transform_indices = @transform_7, window_bounds = array<i64: 1, 8, 32>}]} {
    %c0_i32 = arith.constant 0 : i32
    %0 = arith.cmpi eq, %arg1, %c0_i32 : i32
    %1 = arith.extui %0 : i1 to i32
    %c0_i32_0 = arith.constant 0 : i32
    %2 = arith.cmpi ne, %1, %c0_i32_0 : i32
    scf.if %2 {
      %c0_37 = arith.constant 0 : index
      %c0_38 = arith.constant 0 : index
      %c0_39 = arith.constant 0 : index
      %95 = vector.load %arg2[%c0_37, %c0_38, %c0_39] : memref<1x8x32xbf16, #tpu.memory_space<vmem>>, vector<1x8x32xbf16>
      %96 = vector.shape_cast %95 : vector<1x8x32xbf16> to vector<8x32xbf16>
      %c0_40 = arith.constant 0 : index
      %c0_41 = arith.constant 0 : index
      %97 = vector.load %arg5[%c0_40, %c0_41] : memref<32x64xbf16, #tpu.memory_space<vmem>>, vector<32x64xbf16>
      %cst_42 = arith.constant dense<0.000000e+00> : vector<8x64xf32>
      %98 = tpu.matmul %96, %97, %cst_42 {dimension_numbers = #tpu.dot_dimension_numbers<[1], [0], [0], [1], [0, 0, 1, 1], [], []>} : vector<8x32xbf16>, vector<32x64xbf16>, vector<8x64xf32> -> vector<8x64xf32>
      %c0_43 = arith.constant 0 : index
      %c0_44 = arith.constant 0 : index
      %99 = vector.load %arg6[%c0_43, %c0_44] : memref<1x64xf32, #tpu.memory_space<vmem>>, vector<1x64xf32>
      %100 = vector.broadcast %99 : vector<1x64xf32> to vector<8x64xf32>
      %101 = arith.addf %98, %100 : vector<8x64xf32>
      %102 = arith.truncf %101 : vector<8x64xf32> to vector<8x64xbf16>
      %c0_45 = arith.constant 0 : index
      %c0_46 = arith.constant 0 : index
      %103 = vector.load %arg10[%c0_45, %c0_46] : memref<8x64xbf16, #tpu.memory_space<vmem>>, vector<8x64xbf16>
      tpu.vector_store %arg10[%c0_45, %c0_46], %102 {strides = array<i32>} : memref<8x64xbf16, #tpu.memory_space<vmem>>, vector<8x64xbf16>,
    } else {
    }
    %c8_i32 = arith.constant 8 : i32
    %3 = arith.muli %arg1, %c8_i32 : i32
    %4 = tpu.assume_multiple %3, 8 : i32
    %c0 = arith.constant 0 : index
    %5 = arith.index_cast %4 : i32 to index
    %c0_1 = arith.constant 0 : index
    %6 = vector.load %arg2[%c0, %5, %c0_1] : memref<1x8x32xbf16, #tpu.memory_space<vmem>>, vector<1x8x32xbf16>
    %7 = vector.shape_cast %6 : vector<1x8x32xbf16> to vector<8x32xbf16>
    %c0_2 = arith.constant 0 : index
    %c0_3 = arith.constant 0 : index
    %8 = vector.load %arg3[%c0_2, %c0_3] : memref<32x32xbf16, #tpu.memory_space<vmem>>, vector<32x32xbf16>
    %cst = arith.constant dense<0.000000e+00> : vector<8x32xf32>
    %9 = tpu.matmul %7, %8, %cst {dimension_numbers = #tpu.dot_dimension_numbers<[1], [0], [0], [1], [0, 0, 1, 1], [], []>} : vector<8x32xbf16>, vector<32x32xbf16>, vector<8x32xf32> -> vector<8x32xf32>
    %c0_4 = arith.constant 0 : index
    %c0_5 = arith.constant 0 : index
    %10 = vector.load %arg4[%c0_4, %c0_5] : memref<1x32xf32, #tpu.memory_space<vmem>>, vector<1x32xf32>
    %11 = vector.broadcast %10 : vector<1x32xf32> to vector<8x32xf32>
    %12 = arith.addf %9, %11 : vector<8x32xf32>
    %13 = arith.truncf %12 : vector<8x32xf32> to vector<8x32xbf16>
    %c0_6 = arith.constant 0 : index
    %c0_7 = arith.constant 0 : index
    %14 = vector.load %arg10[%c0_6, %c0_7] : memref<8x64xbf16, #tpu.memory_space<vmem>>, vector<8x32xbf16>
    %c0_8 = arith.constant 0 : index
    %c32 = arith.constant 32 : index
    %15 = vector.load %arg10[%c0_8, %c32] : memref<8x64xbf16, #tpu.memory_space<vmem>>, vector<8x32xbf16>
    %16 = vector.extract_strided_slice %13 {offsets = [0, 0], sizes = [8, 8], strides = [1, 1]} : vector<8x32xbf16> to vector<8x8xbf16>
    %17 = vector.extract_strided_slice %14 {offsets = [0, 0], sizes = [8, 8], strides = [1, 1]} : vector<8x32xbf16> to vector<8x8xbf16>
    %cst_9 = arith.constant dense<0.000000e+00> : vector<8x8xf32>
    %18 = tpu.matmul %16, %17, %cst_9 {dimension_numbers = #tpu.dot_dimension_numbers<[1], [1], [0], [0], [0, 0, 1, 0], [], []>} : vector<8x8xbf16>, vector<8x8xbf16>, vector<8x8xf32> -> vector<8x8xf32>
    %cst_10 = arith.constant dense<0xFF800000> : vector<8xf32>
    %19 = vector.multi_reduction <maximumf>, %18, %cst_10 [1] : vector<8x8xf32> to vector<8xf32>
    %20 = vector.shape_cast %19 : vector<8xf32> to vector<8x1xf32>
    %21 = vector.broadcast %20 : vector<8x1xf32> to vector<8x8xf32>
    %22 = arith.subf %18, %21 : vector<8x8xf32>
    %23 = math.exp %22 : vector<8x8xf32>
    %cst_11 = arith.constant dense<0.000000e+00> : vector<8xf32>
    %24 = vector.multi_reduction <add>, %23, %cst_11 [1] : vector<8x8xf32> to vector<8xf32>
    %25 = vector.shape_cast %24 : vector<8xf32> to vector<8x1xf32>
    %26 = arith.truncf %23 : vector<8x8xf32> to vector<8x8xbf16>
    %27 = vector.extract_strided_slice %15 {offsets = [0, 0], sizes = [8, 8], strides = [1, 1]} : vector<8x32xbf16> to vector<8x8xbf16>
    %cst_12 = arith.constant dense<0.000000e+00> : vector<8x8xf32>
    %28 = tpu.matmul %26, %27, %cst_12 {dimension_numbers = #tpu.dot_dimension_numbers<[1], [0], [0], [1], [0, 0, 1, 1], [], []>} : vector<8x8xbf16>, vector<8x8xbf16>, vector<8x8xf32> -> vector<8x8xf32>
    %29 = tpu.reciprocal %25 {approx = true} : vector<8x1xf32> -> vector<8x1xf32>
    %30 = vector.broadcast %29 : vector<8x1xf32> to vector<8x8xf32>
    %31 = arith.mulf %28, %30 : vector<8x8xf32>
    %32 = arith.truncf %31 : vector<8x8xf32> to vector<8x8xbf16>
    %33 = vector.extract_strided_slice %13 {offsets = [0, 8], sizes = [8, 8], strides = [1, 1]} : vector<8x32xbf16> to vector<8x8xbf16>
    %34 = vector.extract_strided_slice %14 {offsets = [0, 8], sizes = [8, 8], strides = [1, 1]} : vector<8x32xbf16> to vector<8x8xbf16>
    %cst_13 = arith.constant dense<0.000000e+00> : vector<8x8xf32>
    %35 = tpu.matmul %33, %34, %cst_13 {dimension_numbers = #tpu.dot_dimension_numbers<[1], [1], [0], [0], [0, 0, 1, 0], [], []>} : vector<8x8xbf16>, vector<8x8xbf16>, vector<8x8xf32> -> vector<8x8xf32>
    %cst_14 = arith.constant dense<0xFF800000> : vector<8xf32>
    %36 = vector.multi_reduction <maximumf>, %35, %cst_14 [1] : vector<8x8xf32> to vector<8xf32>
    %37 = vector.shape_cast %36 : vector<8xf32> to vector<8x1xf32>
    %38 = vector.broadcast %37 : vector<8x1xf32> to vector<8x8xf32>
    %39 = arith.subf %35, %38 : vector<8x8xf32>
    %40 = math.exp %39 : vector<8x8xf32>
    %cst_15 = arith.constant dense<0.000000e+00> : vector<8xf32>
    %41 = vector.multi_reduction <add>, %40, %cst_15 [1] : vector<8x8xf32> to vector<8xf32>
    %42 = vector.shape_cast %41 : vector<8xf32> to vector<8x1xf32>
    %43 = arith.truncf %40 : vector<8x8xf32> to vector<8x8xbf16>
    %44 = vector.extract_strided_slice %15 {offsets = [0, 8], sizes = [8, 8], strides = [1, 1]} : vector<8x32xbf16> to vector<8x8xbf16>
    %cst_16 = arith.constant dense<0.000000e+00> : vector<8x8xf32>
    %45 = tpu.matmul %43, %44, %cst_16 {dimension_numbers = #tpu.dot_dimension_numbers<[1], [0], [0], [1], [0, 0, 1, 1], [], []>} : vector<8x8xbf16>, vector<8x8xbf16>, vector<8x8xf32> -> vector<8x8xf32>
    %46 = tpu.reciprocal %42 {approx = true} : vector<8x1xf32> -> vector<8x1xf32>
    %47 = vector.broadcast %46 : vector<8x1xf32> to vector<8x8xf32>
    %48 = arith.mulf %45, %47 : vector<8x8xf32>
    %49 = arith.truncf %48 : vector<8x8xf32> to vector<8x8xbf16>
    %50 = vector.extract_strided_slice %13 {offsets = [0, 16], sizes = [8, 8], strides = [1, 1]} : vector<8x32xbf16> to vector<8x8xbf16>
    %51 = vector.extract_strided_slice %14 {offsets = [0, 16], sizes = [8, 8], strides = [1, 1]} : vector<8x32xbf16> to vector<8x8xbf16>
    %cst_17 = arith.constant dense<0.000000e+00> : vector<8x8xf32>
    %52 = tpu.matmul %50, %51, %cst_17 {dimension_numbers = #tpu.dot_dimension_numbers<[1], [1], [0], [0], [0, 0, 1, 0], [], []>} : vector<8x8xbf16>, vector<8x8xbf16>, vector<8x8xf32> -> vector<8x8xf32>
    %cst_18 = arith.constant dense<0xFF800000> : vector<8xf32>
    %53 = vector.multi_reduction <maximumf>, %52, %cst_18 [1] : vector<8x8xf32> to vector<8xf32>
    %54 = vector.shape_cast %53 : vector<8xf32> to vector<8x1xf32>
    %55 = vector.broadcast %54 : vector<8x1xf32> to vector<8x8xf32>
    %56 = arith.subf %52, %55 : vector<8x8xf32>
    %57 = math.exp %56 : vector<8x8xf32>
    %cst_19 = arith.constant dense<0.000000e+00> : vector<8xf32>
    %58 = vector.multi_reduction <add>, %57, %cst_19 [1] : vector<8x8xf32> to vector<8xf32>
    %59 = vector.shape_cast %58 : vector<8xf32> to vector<8x1xf32>
    %60 = arith.truncf %57 : vector<8x8xf32> to vector<8x8xbf16>
    %61 = vector.extract_strided_slice %15 {offsets = [0, 16], sizes = [8, 8], strides = [1, 1]} : vector<8x32xbf16> to vector<8x8xbf16>
    %cst_20 = arith.constant dense<0.000000e+00> : vector<8x8xf32>
    %62 = tpu.matmul %60, %61, %cst_20 {dimension_numbers = #tpu.dot_dimension_numbers<[1], [0], [0], [1], [0, 0, 1, 1], [], []>} : vector<8x8xbf16>, vector<8x8xbf16>, vector<8x8xf32> -> vector<8x8xf32>
    %63 = tpu.reciprocal %59 {approx = true} : vector<8x1xf32> -> vector<8x1xf32>
    %64 = vector.broadcast %63 : vector<8x1xf32> to vector<8x8xf32>
    %65 = arith.mulf %62, %64 : vector<8x8xf32>
    %66 = arith.truncf %65 : vector<8x8xf32> to vector<8x8xbf16>
    %67 = vector.extract_strided_slice %13 {offsets = [0, 24], sizes = [8, 8], strides = [1, 1]} : vector<8x32xbf16> to vector<8x8xbf16>
    %68 = vector.extract_strided_slice %14 {offsets = [0, 24], sizes = [8, 8], strides = [1, 1]} : vector<8x32xbf16> to vector<8x8xbf16>
    %cst_21 = arith.constant dense<0.000000e+00> : vector<8x8xf32>
    %69 = tpu.matmul %67, %68, %cst_21 {dimension_numbers = #tpu.dot_dimension_numbers<[1], [1], [0], [0], [0, 0, 1, 0], [], []>} : vector<8x8xbf16>, vector<8x8xbf16>, vector<8x8xf32> -> vector<8x8xf32>
    %cst_22 = arith.constant dense<0xFF800000> : vector<8xf32>
    %70 = vector.multi_reduction <maximumf>, %69, %cst_22 [1] : vector<8x8xf32> to vector<8xf32>
    %71 = vector.shape_cast %70 : vector<8xf32> to vector<8x1xf32>
    %72 = vector.broadcast %71 : vector<8x1xf32> to vector<8x8xf32>
    %73 = arith.subf %69, %72 : vector<8x8xf32>
    %74 = math.exp %73 : vector<8x8xf32>
    %cst_23 = arith.constant dense<0.000000e+00> : vector<8xf32>
    %75 = vector.multi_reduction <add>, %74, %cst_23 [1] : vector<8x8xf32> to vector<8xf32>
    %76 = vector.shape_cast %75 : vector<8xf32> to vector<8x1xf32>
    %77 = arith.truncf %74 : vector<8x8xf32> to vector<8x8xbf16>
    %78 = vector.extract_strided_slice %15 {offsets = [0, 24], sizes = [8, 8], strides = [1, 1]} : vector<8x32xbf16> to vector<8x8xbf16>
    %cst_24 = arith.constant dense<0.000000e+00> : vector<8x8xf32>
    %79 = tpu.matmul %77, %78, %cst_24 {dimension_numbers = #tpu.dot_dimension_numbers<[1], [0], [0], [1], [0, 0, 1, 1], [], []>} : vector<8x8xbf16>, vector<8x8xbf16>, vector<8x8xf32> -> vector<8x8xf32>
    %80 = tpu.reciprocal %76 {approx = true} : vector<8x1xf32> -> vector<8x1xf32>
    %81 = vector.broadcast %80 : vector<8x1xf32> to vector<8x8xf32>
    %82 = arith.mulf %79, %81 : vector<8x8xf32>
    %83 = arith.truncf %82 : vector<8x8xf32> to vector<8x8xbf16>
    %84 = tpu.concatenate %32, %49, %66, %83 in 1 : vector<8x8xbf16>, vector<8x8xbf16>, vector<8x8xbf16>, vector<8x8xbf16> -> vector<8x32xbf16>
    %c0_25 = arith.constant 0 : index
    %c0_26 = arith.constant 0 : index
    %85 = vector.load %arg11[%c0_25, %c0_26] : memref<8x32xbf16, #tpu.memory_space<vmem>>, vector<8x32xbf16>
    tpu.vector_store %arg11[%c0_25, %c0_26], %84 {strides = array<i32>} : memref<8x32xbf16, #tpu.memory_space<vmem>>, vector<8x32xbf16>,
    %c0_27 = arith.constant 0 : index
    %c0_28 = arith.constant 0 : index
    %86 = vector.load %arg11[%c0_27, %c0_28] : memref<8x32xbf16, #tpu.memory_space<vmem>>, vector<8x32xbf16>
    %c0_29 = arith.constant 0 : index
    %c0_30 = arith.constant 0 : index
    %87 = vector.load %arg7[%c0_29, %c0_30] : memref<32x32xbf16, #tpu.memory_space<vmem>>, vector<32x32xbf16>
    %cst_31 = arith.constant dense<0.000000e+00> : vector<8x32xf32>
    %88 = tpu.matmul %86, %87, %cst_31 {dimension_numbers = #tpu.dot_dimension_numbers<[1], [0], [0], [1], [0, 0, 1, 1], [], []>} : vector<8x32xbf16>, vector<32x32xbf16>, vector<8x32xf32> -> vector<8x32xf32>
    %c0_32 = arith.constant 0 : index
    %c0_33 = arith.constant 0 : index
    %89 = vector.load %arg8[%c0_32, %c0_33] : memref<1x32xf32, #tpu.memory_space<vmem>>, vector<1x32xf32>
    %90 = vector.broadcast %89 : vector<1x32xf32> to vector<8x32xf32>
    %91 = arith.addf %88, %90 : vector<8x32xf32>
    %c0_34 = arith.constant 0 : index
    %c0_35 = arith.constant 0 : index
    %c0_36 = arith.constant 0 : index
    %92 = vector.load %arg9[%c0_34, %c0_35, %c0_36] : memref<1x8x32xf32, #tpu.memory_space<vmem>>, vector<1x8x32xf32>
    %93 = vector.shape_cast %92 : vector<1x8x32xf32> to vector<8x32xf32>
    %94 = vector.shape_cast %91 : vector<8x32xf32> to vector<1x8x32xf32>
    tpu.vector_store %arg9[%c0_34, %c0_35, %c0_36], %94 {strides = array<i32>} : memref<1x8x32xf32, #tpu.memory_space<vmem>>, vector<1x8x32xf32>,
    return
  }
  func.func @transform_0(%arg0: i32, %arg1: i32) -> (i32, i32, i32) {
    %c0_i32 = arith.constant 0 : i32
    %c0_i32_0 = arith.constant 0 : i32
    %c0_i32_1 = arith.constant 0 : i32
    return %arg0, %c0_i32, %c0_i32_0 : i32, i32, i32
  }
  func.func @transform_1(%arg0: i32, %arg1: i32) -> (i32, i32) {
    %c0_i32 = arith.constant 0 : i32
    %c0_i32_0 = arith.constant 0 : i32
    %c0_i32_1 = arith.constant 0 : i32
    return %c0_i32, %c0_i32_0 : i32, i32
  }
  func.func @transform_2(%arg0: i32, %arg1: i32) -> (i32, i32) {
    %c0_i32 = arith.constant 0 : i32
    %c0_i32_0 = arith.constant 0 : i32
    %c0_i32_1 = arith.constant 0 : i32
    return %c0_i32, %c0_i32_0 : i32, i32
  }
  func.func @transform_3(%arg0: i32, %arg1: i32) -> (i32, i32) {
    %c0_i32 = arith.constant 0 : i32
    %c0_i32_0 = arith.constant 0 : i32
    %c0_i32_1 = arith.constant 0 : i32
    return %c0_i32, %c0_i32_0 : i32, i32
  }
  func.func @transform_4(%arg0: i32, %arg1: i32) -> (i32, i32) {
    %c0_i32 = arith.constant 0 : i32
    %c0_i32_0 = arith.constant 0 : i32
    %c0_i32_1 = arith.constant 0 : i32
    return %c0_i32, %c0_i32_0 : i32, i32
  }
  func.func @transform_5(%arg0: i32, %arg1: i32) -> (i32, i32) {
    %c0_i32 = arith.constant 0 : i32
    %c0_i32_0 = arith.constant 0 : i32
    %c0_i32_1 = arith.constant 0 : i32
    return %c0_i32, %c0_i32_0 : i32, i32
  }
  func.func @transform_6(%arg0: i32, %arg1: i32) -> (i32, i32) {
    %c0_i32 = arith.constant 0 : i32
    %c0_i32_0 = arith.constant 0 : i32
    %c0_i32_1 = arith.constant 0 : i32
    return %c0_i32, %c0_i32_0 : i32, i32
  }
  func.func @transform_7(%arg0: i32, %arg1: i32) -> (i32, i32, i32) {
    %c0_i32 = arith.constant 0 : i32
    %c0_i32_0 = arith.constant 0 : i32
    return %arg0, %arg1, %c0_i32 : i32, i32, i32
  }
}

</mosaic_0001>

<bundles_post_ra>
// kernel: tpu_custom_call.1
= control target key start
LH: loop header
LB: loop body
LE: loop exit
PB: predicated region body
PF: predicated region fallthrough
CT: control target
= control target key end

     0   :  { %s1544_s0 = inlined_call_operand.hbm [shape: bf16[2,8,32], index: 0, kind: input, shape index: {}]   ;;  %s1545_s1 = inlined_call_operand.hbm [shape: bf16[32,32], index: 1, kind: input, shape index: {}]   ;;  %s1546_s2 = inlined_call_operand.vmem [shape: f32[1,32], index: 2, kind: input, shape index: {}]   ;;  %s1547_s3 = inlined_call_operand.hbm [shape: bf16[32,64], index: 3, kind: input, shape index: {}]   ;;  %s1548_s4 = inlined_call_operand.vmem [shape: f32[1,64], index: 4, kind: input, shape index: {}]   ;;  %s1549_s5 = inlined_call_operand.hbm [shape: bf16[32,32], index: 5, kind: input, shape index: {}]   ;;  %s1550_s6 = inlined_call_operand.vmem [shape: f32[1,32], index: 6, kind: input, shape index: {}]   ;;  %s1551_s7 = inlined_call_operand.hbm [shape: f32[2,8,32], index: 7, kind: output, shape index: {}]  }
   0x1   :  { %1552 = sst [smem:[#allocation17_spill]] %s1545_s1 }
   0x2   :  { %1553 = sst [smem:[#allocation18_spill]] %s1547_s3 }
   0x3   :  { %12 = vsyncpa [#allocation5], 0 }
   0x4   :  { %14 = vsyncpa [#allocation5 + $0x1], 0 }
   0x5   :  { %15 = vsyncpa [#allocation8], 0 }
   0x6   :  { %16 = vsyncpa [#allocation11], 0 }
   0x7   :  { %17 = vsyncpa [#allocation6], 0 }
   0x8   :  { %19 = vsyncpa [#allocation6 + $0x1], 0  ;;  %s1326_s24 = smov 0   ;;  %s1328_s25 = smov 0  }
   0x9   :  { %s1330_s26 = smov 0   ;;  %s1332_s27 = smov 0  }
   0xa   :  { %s1334_s28 = smov 0   ;;  %s1336_s29 = smov 0  }
   0xb LB: > { %s875_s30 = sadd.s32 4294967295, %s1269_s29   ;;  %p877_p0 = scmp.ge.s32.totalorder %s1269_s29, 1  ;;  %s1269_s29 = sphi %s1336_s29, %s25_s29   ;;  %s1265_s28 = sphi %s1334_s28, %s1567_s28   ;;  %s1261_s27 = sphi %s1332_s27, %s1566_s27   ;;  %s1257_s26 = sphi %s1330_s26, %s1565_s26   ;;  %s1253_s25 = sphi %s1328_s25, %s1564_s25   ;;  %s1249_s24 = sphi %s1326_s24, %s1563_s24  }
   0xc   : > { %p1360_p1 = scmp.eq.s32.totalorder %s875_s30, 0  ;;  %p222_p2 = scmp.lt.s32.totalorder %s1269_s29, 3 }
   0xd   : > { %s1555_s1 = sld [smem:[#allocation17_spill]]  ;;  %s1271_s13 = smov [#allocation7]  }
   0xe   : > { %p1368_p3 = pnand %p877_p0, %p222_p2  ;;  %s235_s14 = sshll.u32 %s1271_s13, 4  ;;  %s236_s14 = int_to_ptr.vmem [resolvable:$true] %s235_s14 }
   0xf   : > { %p881_p6 = scmp.ge.s32.totalorder %s1269_s29, 2  ;;  %s1558_s3 = sld [smem:[#allocation18_spill]] }
  0x10   : > { %p951_p4 = pneg %p1368_p3  ;;  %s1272_s19 = smov 64  }
  0x11   : > { %s1273_s20 = smov 4   ;;  %s1274_s21 = smov [#allocation9]  }
  0x12   : > { %p1376_p5 = pnand %p951_p4, %p1360_p1  ;;  %s252_s22 = sshll.u32 %s1274_s21, 4  ;;  %s253_s22 = int_to_ptr.vmem [resolvable:$true] %s252_s22 }
  0x13   : > { %s233_s11 = sshll.u32 %s1555_s1, 4  ;;  %s267_s10 = sshll.u32 %s1549_s5, 4  ;;  %s234_s11 = int_to_ptr.hbm [resolvable:$true] %s233_s11  ;;  %s268_s10 = int_to_ptr.hbm [resolvable:$true] %s267_s10 }
  0x14   : > { %954 = dma.hbm_to_vmem [thread:$0]  (!%p1376_p5), %s234_s11, 256, %s236_s14, [#allocation8], %s1272_s19, %s1272_s19, %s1273_s20  }
  0x15   : > { %s250_s18 = sshll.u32 %s1558_s3, 4  ;;  %s1275_s13 = smov [#allocation10]   ;;  %s251_s18 = int_to_ptr.hbm [resolvable:$true] %s250_s18 }
  0x16   : > { %957 = dma.hbm_to_vmem [thread:$0]  (!%p1376_p5), %s251_s18, 256, %s253_s22, [#allocation8], %s1272_s19, %s1272_s19, %s1273_s20  }
  0x17   : > { %s269_s16 = sshll.u32 %s1275_s13, 4  ;;  %s876_s11 = sadd.s32 4294967294, %s1269_s29   ;;  %s270_s16 = int_to_ptr.vmem [resolvable:$true] %s269_s16 }
  0x18   : > { %960 = dma.hbm_to_vmem [thread:$0]  (!%p1376_p5), %s268_s10, 256, %s270_s16, [#allocation11], %s1272_s19, %s1272_s19, %s1273_s20  }
  0x19   : > { %s37_s14 = sadd.s32 1, %s1265_s28  ;;  %s44_s17 = sadd.s32 1, %s1257_s26 }
  0x1a   : > { %p39_p7 = scmp.ge.s32.totalorder %s37_s14, 2  ;;  %p51_p8 = scmp.ne.s32.totalorder %s1257_s26, %s1253_s25 }
  0x1b   : > { %p52_p9 = scmp.eq.s32.totalorder %s1269_s29, 0  ;;  %p57_p10 = scmp.ne.s32.totalorder %s1253_s25, %s1249_s24 }
  0x1c   : > { %s1569_s14 = smov (%p39_p7, %s37_s14), 0  ;;  %p209_p13 = scmp.eq.s32.totalorder %s875_s30, 1 }
  0x1d   : > { %p1403_p11 = por %p52_p9, %p51_p8  ;;  %p1409_p12 = por %p1360_p1, %p57_p10 }
  0x1e   : > { %s41_s19 = ssub.s32 %s1265_s28, %s1569_s14  ;;  %p215_p2 = scmp.eq.s32.totalorder %s876_s11, 1 }
  0x1f   : > { %p42_p0 = scmp.eq.s32.totalorder %s41_s19, 0  ;;  %p1417_p4 = por %p209_p13, %p51_p8 }
  0x20   : > { %p972_p5 = scmp.lt.s32.totalorder %s1269_s29, 2  ;;  %p1425_p7 = por %p215_p2, %p57_p10 }
  0x21   : > { %s1423_s21 = scalar_select %p42_p0, %s1257_s26, %s44_s17  }
  0x22   : > { %s286_s23 = sand.u32 1, %s1257_s26   ;;  %s883_s10 = sshll.u32 %s1265_s28, 2 }
  0x23   : > { %s882_s9 = sshll.u32 %s286_s23, 2  ;;  %s294_s30 = scalar_lea.hbm %s1544_s0, %s883_s10 }
  0x24   : > { %s290_s19 = scalar_lea.vmem [#allocation4], %s882_s9  ;;  %s296_s1 = sshll.u32 %s294_s30, 4  ;;  %s297_s1 = int_to_ptr.hbm [resolvable:$true] %s296_s1 }
  0x25   : > { %s298_s11 = sshll.u32 %s290_s19, 4  ;;  %p962_p8 = pnand %p972_p5, %p1403_p11  ;;  %s299_s11 = int_to_ptr.vmem [resolvable:$true] %s298_s11 }
  0x26   : > { %s287_s17 = scalar_lea.sflag [#allocation5], %s286_s23  ;;  %307 = sbr.rel (%p1368_p3) target bundleno = 1160 (0x488), region = 48 }
  0x27   : > { %964 = dma.hbm_to_vmem [thread:$0]  (!%p962_p8), %s297_s1, 64, %s299_s11, %s287_s17  }
  0x28   : > { %s1439_s3 = sand.u32 (!%p1368_p3), 1, %s1253_s25  }
  0x29   : > { %s885_s13 = sshll.u32 (!%p1368_p3), %s1439_s3, 2  ;;  %s310_s10 = scalar_lea.sflag (!%p1368_p3), [#allocation5], %s1439_s3 }
  0x2a   : > { %s313_s9 = scalar_lea.vmem (!%p1368_p3), [#allocation4], %s885_s13 }
  0x2b   : > { %1232 = dma.done.wait (%p1409_p12), %s310_s10, 64  }
  0x2c   : > { %1234 = vsyncadd (%p1409_p12), %s310_s10, 4294967232 }
  0x2d   : > { %1236 = dma.done.wait (%p1360_p1), [#allocation8], 512  }
  0x2e   : > { %1238 = vsyncadd (%p1360_p1), [#allocation8], 4294966784 }
  0x2f   : > { %1240 = dma.done.wait (%p1360_p1), [#allocation11], 256  }
  0x30   : > { %1242 = vsyncadd (%p1360_p1), [#allocation11], 4294967040  ;;  %v930_v0 = vld [vmem:[#allocation9 + $0x8] sm:$0xff]  ;;  %v932_v1 = vld [vmem:[#allocation7 + $0x8] sm:$0xff]  ;;  %vm386_vm0 = vcmask 261120   ;;  %vm404_vm1 = vcmask 519168  }
  0x31   : > { %396 = vmatpush.bf16.msra.mxu0 %v930_v0  ;;  %v929_v2 = vld [vmem:[#allocation9] sm:$0xff]  ;;  %442 = vmatpush.bf16.msra.mxu1 %v932_v1  ;;  %v931_v3 = vld [vmem:[#allocation7] sm:$0xff]  ;;  %v365_v4 = vld [vmem:[%s313_s9] sm:$0xf]  ;;  %vm451_vm2 = vcmask 64512   ;;  %s1276_s15 = smov 112  }
  0x32   : > { %v411_v5 = vld [vmem:[%s313_s9] sm:$0xf]  ;;  %v1040_v6 = vld [vmem:[%s1548_s4] ss:$0 sm:$0xff]  ;;  %s1277_s23 = smov 120   ;;  %s1278_s16 = smov 104  }
  0x33   : > { %v1041_v11 = vld [vmem:[%s1546_s2] ss:$0 sm:$0xff]  ;;  %s1279_s30 = smov 96   ;;  %s1280_s19 = smov 88   ;;  %vm489_vm3 = vcmask 1043456   ;;  %vm701_vm4 = vcmask 130048  }
  0x34   : > { %s1281_s11 = smov 80   ;;  %s1282_s17 = smov 72   ;;  %vm704_vm5 = vcmask 195584   ;;  %vm708_vm6 = vcmask 257024  }
  0x35   : > { %397 = vmatpush.bf16.msra.mxu0 %v929_v2  ;;  %443 = vmatpush.bf16.msra.mxu1 %v931_v3  ;;  %s1283_s13 = smov 16   ;;  %s1284_s10 = smov 8  }
  0x36   : > { %s1285_s9 = smov 24   ;;  %s926_s1 = sshll.u32 %s1261_s27, 3 }
  0x37   : > { %s889_s12 = sshll.u32 %s1439_s3, 3  ;;  %s749_s27 = scalar_lea.sflag [#allocation6], %s1439_s3 }
  0x38   : > { %898 = vmatmul.msk.bf16.vlgmr.msra.gmra.mxu0 %vm386_vm0, %v365_v4  ;;  %907 = vmatmul.msk.bf16.vlgmr.msra.gmra.mxu1 %vm386_vm0, %v411_v5 }
  0xb5   : > { %v399_v7 = vpop.f32.mrf.mxu0  ;;  %v445_v9 = vpop.f32.mrf.mxu1 }
  0xb6   : > { %v400_v8 = vadd.f32 %v1040_v6, %v399_v7  ;;  %v446_v13 = vadd.f32 %v1041_v11, %v445_v9 }
  0xb8   : > { %v403_v10 = vpack.c.bf16 %v400_v8, %v400_v8  ;;  %v449_v16 = vpack.c.bf16 %v446_v13, %v446_v13 }
  0xba   : > { %405 = vst.msk [vmem:[#allocation2] sm:$0xf] %vm404_vm1, %v403_v10  ;;  %v510_v20 = vunpack.c.l.b16 %v449_v16 }
  0xbc   : > { %v511_v21 = vpack.c.b16 %v510_v20, %v510_v20 }
  0xbd   : > { %v401_v12 = vpop.f32.mrf.mxu0  ;;  %v447_v14 = vpop.f32.mrf.mxu1 }
  0xc1   : > { %v450_v15 = vld [vmem:[#allocation2] sm:$0xf] }
  0xc2   : > { %v456_v17 = vsel %vm451_vm2, %v450_v15, 0  ;;  %v482_v18 = vunpack.c.l.b16 %v450_v15 }
  0xc3   : > { %465 = vmatpush.bf16.xpose.msra.mxu2 %v456_v17 }
  0xc4   : > { %v1464_v19 = vpack.c.b16 %v482_v18, %v482_v18 }
  0xc6   : > { %571 = vrot.lane.b32.xlu2 %v1464_v19, %s1276_s15  ;;  %514 = vrot.lane.b32.xlu1 %v1464_v19, %s1277_s23 }
  0xca   : > { %908 = vmatmul.msk.bf16.vlgmr.msra.gmra.mxu2 %vm451_vm2, %v449_v16 }
  0xce   : > { %628 = vrot.lane.b32.xlu2 %v1464_v19, %s1278_s16  ;;  %512 = vrot.lane.b32.xlu1 %v511_v21, %s1277_s23 }
  0xd6   : > { %626 = vrot.lane.b32.xlu2 %v511_v21, %s1278_s16  ;;  %569 = vrot.lane.b32.xlu1 %v511_v21, %s1276_s15  ;;  %s760_s15 = scalar_lea.hbm %s1551_s7, %s926_s1  ;;  %s1199_s1 = scalar_lea.hbm %s1551_s7, 16 }
 0x120   : > { %v572_v22 = vpop.permute.xlu2 %571 }
 0x121   : > { %v577_v23 = vsel %vm451_vm2, %v572_v22, 0 }
 0x122   : > { %586 = vmatpush.bf16.xpose.msrb.mxu1 %v577_v23 }
 0x128   : > { %v629_v39 = vpop.permute.xlu2 %628 }
 0x129   : > { %v634_v42 = vsel %vm451_vm2, %v629_v39, 0 }
 0x130   : > { %v627_v45 = vpop.permute.xlu2 %626 }
 0x138   : > { %v515_v24 = vpop.permute.xlu1 %514 }
 0x139   : > { %v520_v40 = vsel %vm451_vm2, %v515_v24, 0 }
 0x140   : > { %v513_v25 = vpop.permute.xlu1 %512 }
 0x148   : > { %v570_v26 = vpop.permute.xlu1 %569 }
 0x149   : > { %912 = vmatmul.msk.bf16.vlgmr.msrb.gmra.mxu1 %vm451_vm2, %v570_v26 }
 0x14d   : > { %v467_v27 = vpop.f32.mrf.mxu2 }
 0x14e   : > { %v471_v28 = vsel %vm451_vm2, %v467_v27, -inf }
 0x14f   : > { %472 = vmax.xlane.f32.xlu0 %v471_v28 }
 0x155   : > { %v469_v29 = vpop.f32.mrf.mxu2 }
 0x163   : > { %484 = vrot.lane.b32.xlu0 %v1464_v19, %s1279_s30  ;;  %s359_s30 = scalar_lea.vmem [#allocation12], %s889_s12 }
 0x16b   : > { %545 = vrot.lane.b32.xlu0 %v1464_v19, %s1280_s19  ;;  %s762_s19 = sshll.u32 %s359_s30, 4  ;;  %s763_s19 = int_to_ptr.vmem [resolvable:$true] %s762_s19 }
 0x1c2   : > { %v473_v30 = vpop.xlane.xlu0 %472 }
 0x1c3   : > { %v474_v32 = vsub.f32 %v467_v27, %v473_v30 }
 0x1c5   : > { %v475_v34 = vmul.f32 1.442695, %v474_v32 }
 0x1c6   : > { %v588_v31 = vpop.f32.mrf.mxu1 }
 0x1c7   : > { %v592_v33 = vsel %vm451_vm2, %v588_v31, -inf  ;;  %1043 = vpow2.f32 %v475_v34 }
 0x1c8   : > { %593 = vmax.xlane.f32.xlu2 %v592_v33 }
 0x1cd   : > { %v1044_v36 = vpop.eup %1043 }
 0x1ce   : > { %v590_v35 = vpop.f32.mrf.mxu1  ;;  %v480_v41 = vpack.c.bf16 %v1044_v36, %v1044_v36  ;;  %v477_v62 = vsel %vm451_vm2, %v1044_v36, 0.0 }
 0x1d5   : > { %v485_v37 = vpop.permute.xlu0 %484 }
 0x1d6   : > { %v491_v38 = vsel %vm489_vm3, %v485_v37, 0  ;;  %v934_v37 = vld [vmem:[#allocation10 + $0x8] sm:$0xff] }
 0x1d7   : > { %500 = vmatpush.bf16.msra.mxu3 %v491_v38  ;;  %740 = vmatpush.bf16.msra.mxu1 %v934_v37  ;;  %v933_v38 = vld [vmem:[#allocation10] sm:$0xff] }
 0x1da   : > { %909 = vmatmul.msk.bf16.vlgmr.msra.gmra.mxu3 %vm451_vm2, %v480_v41 }
 0x1db   : > { %529 = vmatpush.bf16.xpose.msrb.mxu3 %v520_v40  ;;  %741 = vmatpush.bf16.msra.mxu1 %v933_v38 }
 0x1dd   : > { %v546_v43 = vpop.permute.xlu0 %545 }
 0x1de   : > { %v551_v44 = vsel %vm489_vm3, %v546_v43, 0 }
 0x1df   : > { %560 = vmatpush.bf16.msrb.mxu0 %v551_v44 }
 0x1e0   : > { %602 = vrot.lane.b32.xlu2 %v1464_v19, %s1281_s11  ;;  %s764_s11 = sshll.u32 %s760_s15, 4  ;;  %s765_s11 = int_to_ptr.hbm [resolvable:$true] %s764_s11 }
 0x1e3   : > { %643 = vmatpush.bf16.xpose.msra.mxu3 %v634_v42 }
 0x1ea   : > { %910 = vmatmul.msk.bf16.vlgmr.msrb.gmra.mxu3 %vm451_vm2, %v513_v25 }
 0x1fa   : > { %914 = vmatmul.msk.bf16.vlgmr.msra.gmra.mxu3 %vm451_vm2, %v627_v45 }
 0x23b   : > { %v594_v46 = vpop.xlane.xlu2 %593 }
 0x23c   : > { %v595_v47 = vsub.f32 %v588_v31, %v594_v46 }
 0x23e   : > { %v596_v48 = vmul.f32 1.442695, %v595_v47 }
 0x240   : > { %1045 = vpow2.f32 %v596_v48 }
 0x243   : > { %v603_v49 = vpop.permute.xlu2 %602 }
 0x244   : > { %v608_v50 = vsel %vm489_vm3, %v603_v49, 0 }
 0x245   : > { %617 = vmatpush.bf16.msrb.mxu2 %v608_v50  ;;  %v1042_v50 = vld [vmem:[%s1550_s6] ss:$0 sm:$0xff] }
 0x246   : > { %v1046_v51 = vpop.eup %1045 }
 0x247   : > { %v601_v52 = vpack.c.bf16 %v1046_v51, %v1046_v51  ;;  %v598_v61 = vsel %vm451_vm2, %v1046_v51, 0.0 }
 0x249   : > { %913 = vmatmul.msk.bf16.vlgmr.msrb.gmra.mxu2 %vm451_vm2, %v601_v52 }
 0x25d   : > { %v1486_v53 = vpop.f32.mrf.mxu3 }
 0x265   : > { %v504_v54 = vpop.f32.mrf.mxu3 }
 0x26d   : > { %v531_v55 = vpop.f32.mrf.mxu3 }
 0x26e   : > { %v535_v56 = vsel %vm451_vm2, %v531_v55, -inf }
 0x26f   : > { %536 = vmax.xlane.f32.xlu1 %v535_v56 }
 0x275   : > { %v533_v57 = vpop.f32.mrf.mxu3 }
 0x27d   : > { %v645_v58 = vpop.f32.mrf.mxu3 }
 0x27e   : > { %v649_v59 = vsel %vm451_vm2, %v645_v58, -inf }
 0x27f   : > { %650 = vmax.xlane.f32.xlu0 %v649_v59 }
 0x285   : > { %v647_v60 = vpop.f32.mrf.mxu3 }
 0x287   : > { %599 = vadd.xlane.f32.xlu0 %v598_v61 }
 0x288   : > { %659 = vrot.lane.b32.xlu1 %v1464_v19, %s1282_s17  ;;  %s1193_s17 = sshra.s32 %s765_s11, 4  ;;  %s1194_s17 = int_to_ptr.hbm [resolvable:$true] %s1193_s17 }
 0x289   : > { %p1200_p10 = scmp.lt.s32.totalorder %s1194_s17, %s1551_s7 }
 0x2b2   : > { %478 = vadd.xlane.f32.xlu1 %v477_v62 }
 0x2cc   : > { %v619_v63 = vpop.f32.mrf.mxu2 }
 0x2d4   : > { %v621_v0 = vpop.f32.mrf.mxu2 }
 0x2e2   : > { %v537_v1 = vpop.xlane.xlu1 %536 }
 0x2e3   : > { %v538_v2 = vsub.f32 %v531_v55, %v537_v1 }
 0x2e5   : > { %v539_v3 = vmul.f32 1.442695, %v538_v2 }
 0x2e7   : > { %1047 = vpow2.f32 %v539_v3 }
 0x2ed   : > { %v1048_v4 = vpop.eup %1047 }
 0x2ee   : > { %v541_v5 = vsel %vm451_vm2, %v1048_v4, 0.0  ;;  %v544_v6 = vpack.c.bf16 %v1048_v4, %v1048_v4 }
 0x2ef   : > { %542 = vadd.xlane.f32.xlu0 %v541_v5 }
 0x2f0   : > { %911 = vmatmul.msk.bf16.vlgmr.msrb.gmra.mxu0 %vm451_vm2, %v544_v6 }
 0x2f2   : > { %v651_v7 = vpop.xlane.xlu0 %650 }
 0x2f3   : > { %v652_v8 = vsub.f32 %v645_v58, %v651_v7 }
 0x2f5   : > { %v653_v9 = vmul.f32 1.442695, %v652_v8 }
 0x2f7   : > { %1049 = vpow2.f32 %v653_v9 }
 0x2fa   : > { %v660_v10 = vpop.permute.xlu1 %659  ;;  %v600_v11 = vpop.xlane.xlu0 %599 }
 0x2fb   : > { %v665_v12 = vsel %vm489_vm3, %v660_v10, 0  ;;  %1051 = vrcp.f32 %v600_v11 }
 0x2fc   : > { %674 = vmatpush.bf16.msra.mxu0 %v665_v12 }
 0x2fd   : > { %v1050_v13 = vpop.eup %1049 }
 0x2fe   : > { %v658_v14 = vpack.c.bf16 %v1050_v13, %v1050_v13  ;;  %v655_v15 = vsel %vm451_vm2, %v1050_v13, 0.0 }
 0x2ff   : > { %656 = vadd.xlane.f32.xlu2 %v655_v15 }
 0x300   : > { %915 = vmatmul.msk.bf16.vlgmr.msra.gmra.mxu0 %vm451_vm2, %v658_v14 }
 0x301   : > { %v1052_v16 = vpop.eup %1051 }
 0x302   : > { %v624_v17 = vmul.f32 %v1052_v16, %v619_v63 }
 0x304   : > { %v625_v18 = vpack.c.bf16 %v624_v17, %v624_v17 }
 0x306   : > { %v689_v19 = vunpack.c.l.b16 %v625_v18 }
 0x308   : > { %v690_v20 = vpack.c.b16 %v689_v19, %v689_v19 }
 0x30a   : > { %691 = vrot.lane.b32.xlu0 %v690_v20, %s1283_s13  ;;  %s1195_s13 = scalar_lea.hbm %s1194_s17, 8 }
 0x30b   : > { %p1196_p1 = scmp.ne.s32.totalorder %s1194_s17, %s1195_s13  ;;  %p1201_p11 = scmp.lt.s32.totalorder %s1199_s1, %s1195_s13 }
 0x30d   : > { %p1197_p3 = pnand %p1196_p1, %p1417_p4  ;;  %p1202_p12 = por %p1201_p11, %p1200_p10 }
 0x30f   : > { %p1198_p9 = pneg %p1197_p3 }
 0x311   : > { %p1203_p13 = pnand %p1202_p12, %p1198_p9 }
 0x325   : > { %v479_v39 = vpop.xlane.xlu1 %478 }
 0x362   : > { %v543_v21 = vpop.xlane.xlu0 %542 }
 0x363   : > { %1053 = vrcp.f32 %v543_v21 }
 0x369   : > { %v1054_v22 = vpop.eup %1053 }
 0x36d   : > { %v562_v23 = vpop.f32.mrf.mxu0 }
 0x36e   : > { %v567_v24 = vmul.f32 %v1054_v22, %v562_v23 }
 0x370   : > { %v568_v25 = vpack.c.bf16 %v567_v24, %v567_v24 }
 0x372   : > { %v684_v26 = vunpack.c.l.b16 %v568_v25  ;;  %v657_v28 = vpop.xlane.xlu2 %656 }
 0x373   : > { %1055 = vrcp.f32 %v657_v28 }
 0x374   : > { %v685_v27 = vpack.c.b16 %v684_v26, %v684_v26  ;;  %1057 = vrcp.f32 %v479_v39 }
 0x375   : > { %v564_v29 = vpop.f32.mrf.mxu0 }
 0x376   : > { %686 = vrot.lane.b32.xlu0 %v685_v27, %s1284_s10 }
 0x379   : > { %v1056_v30 = vpop.eup %1055 }
 0x37a   : > { %v1058_v41 = vpop.eup %1057 }
 0x37b   : > { %v507_v42 = vmul.f32 %v1058_v41, %v1486_v53 }
 0x37c   : > { %v692_v40 = vpop.permute.xlu0 %691 }
 0x37d   : > { %v676_v31 = vpop.f32.mrf.mxu0  ;;  %v508_v44 = vpack.c.bf16 %v507_v42, %v507_v42 }
 0x37e   : > { %v681_v32 = vmul.f32 %v1056_v30, %v676_v31 }
 0x380   : > { %v682_v33 = vpack.c.bf16 %v681_v32, %v681_v32 }
 0x382   : > { %v694_v34 = vunpack.c.l.b16 %v682_v33 }
 0x384   : > { %v695_v35 = vpack.c.b16 %v694_v34, %v694_v34 }
 0x385   : > { %v678_v36 = vpop.f32.mrf.mxu0 }
 0x386   : > { %696 = vrot.lane.b32.xlu0 %v695_v35, %s1285_s9 }
 0x3e8   : > { %v687_v43 = vpop.permute.xlu0 %686 }
 0x3e9   : > { %v700_v45 = vsel %vm451_vm2, %v508_v44, %v687_v43 }
 0x3ea   : > { %v703_v46 = vsel %vm701_vm4, %v700_v45, %v692_v40 }
 0x3f8   : > { %v697_v47 = vpop.permute.xlu0 %696 }
 0x3f9   : > { %v706_v48 = vsel %vm704_vm5, %v703_v46, %v697_v47 }
 0x3fa   : > { %709 = vst.msk [vmem:[#allocation3] sm:$0xf] %vm708_vm6, %v706_v48 }
 0x401   : > { %v710_v49 = vld [vmem:[#allocation3] sm:$0xf] }
 0x402   : > { %924 = vmatmul.msk.bf16.vlgmr.msra.gmra.mxu1 %vm386_vm0, %v710_v49 }
 0x47f   : > { %v743_v51 = vpop.f32.mrf.mxu1 }
 0x480   : > { %v744_v52 = vadd.f32 %v1042_v50, %v743_v51 }
 0x482   : > { %747 = vst.msk [vmem:[%s359_s30] sm:$0xff] %vm386_vm0, %v744_v52 }
 0x483   : > { %1206 = shalt.err (!%p1203_p13)
}
 0x484   : > { %949 = dma.vmem_to_hbm [thread:$0]  (%p1417_p4), %s763_s19, 128, %s765_s11, %s749_s27  }
 0x487   : > { %v745_v53 = vpop.f32.mrf.mxu1 }
 0x488 PF: > { %s776_s3 = sand.u32 1, %s1249_s24   ;;  %p966_p0 = pnand %p881_p6, %p1425_p7 }
 0x489   : > { %s777_s18 = scalar_lea.sflag [#allocation6], %s776_s3 }
 0x48a   : > { %p967_p2 = pneg %p966_p0 }
 0x48c   : > { %1244 = dma.done.wait (%p967_p2), %s777_s18, 128  }
 0x48d   : > { %1246 = vsyncadd (%p967_p2), %s777_s18, 4294967168  ;;  %s25_s29 = sadd.s32 1, %s1269_s29   ;;  %s1563_s24 = smov %s1253_s25 }
 0x48e   : > { %p22_p5 = scmp.ge.s32.totalorder %s25_s29, 4   ;;  %s1564_s25 = smov %s1257_s26 }
 0x48f   : > { %s1565_s26 = smov %s1423_s21  ;;  %s1566_s27 = smov %s1265_s28 }
 0x490   : > { %s1567_s28 = smov %s1569_s14  ;;  %24 = sbr.rel (!%p22_p5) target bundleno = 11 (0xb), region = 110 }
 0x495   :  { %783 = vsyncpa [#allocation5], 1 }
 0x496   :  { %785 = vsyncpa [#allocation5 + $0x1], 1 }
 0x497   :  { %786 = vsyncpa [#allocation8], 1 }
 0x498   :  { %787 = vsyncpa [#allocation11], 1 }
 0x499   :  { %788 = vsyncpa [#allocation6], 1 }
 0x49a   :  { %790 = vsyncpa [#allocation6 + $0x1], 1 }

// kernel: tpu_custom_call.1
= control target key start
LH: loop header
LB: loop body
LE: loop exit
PB: predicated region body
PF: predicated region fallthrough
CT: control target
= control target key end

     0   :  { %s1544_s0 = inlined_call_operand.hbm [shape: bf16[2,8,32], index: 0, kind: input, shape index: {}]   ;;  %s1545_s1 = inlined_call_operand.hbm [shape: bf16[32,32], index: 1, kind: input, shape index: {}]   ;;  %s1546_s2 = inlined_call_operand.vmem [shape: f32[1,32], index: 2, kind: input, shape index: {}]   ;;  %s1547_s3 = inlined_call_operand.hbm [shape: bf16[32,64], index: 3, kind: input, shape index: {}]   ;;  %s1548_s4 = inlined_call_operand.vmem [shape: f32[1,64], index: 4, kind: input, shape index: {}]   ;;  %s1549_s5 = inlined_call_operand.hbm [shape: bf16[32,32], index: 5, kind: input, shape index: {}]   ;;  %s1550_s6 = inlined_call_operand.vmem [shape: f32[1,32], index: 6, kind: input, shape index: {}]   ;;  %s1551_s7 = inlined_call_operand.hbm [shape: f32[2,8,32], index: 7, kind: output, shape index: {}]  }
   0x1   :  { %1552 = sst [smem:[#allocation17_spill]] %s1545_s1 }
   0x2   :  { %1553 = sst [smem:[#allocation18_spill]] %s1547_s3 }
   0x3   :  { %12 = vsyncpa [#allocation5], 0 }
   0x4   :  { %14 = vsyncpa [#allocation5 + $0x1], 0 }
   0x5   :  { %15 = vsyncpa [#allocation8], 0 }
   0x6   :  { %16 = vsyncpa [#allocation11], 0 }
   0x7   :  { %17 = vsyncpa [#allocation6], 0 }
   0x8   :  { %19 = vsyncpa [#allocation6 + $0x1], 0  ;;  %s1326_s24 = smov 0   ;;  %s1328_s25 = smov 0  }
   0x9   :  { %s1330_s26 = smov 0   ;;  %s1332_s27 = smov 0  }
   0xa   :  { %s1334_s28 = smov 0   ;;  %s1336_s29 = smov 0  }
   0xb LB: > { %s875_s30 = sadd.s32 4294967295, %s1269_s29   ;;  %p877_p0 = scmp.ge.s32.totalorder %s1269_s29, 1  ;;  %s1269_s29 = sphi %s1336_s29, %s25_s29   ;;  %s1265_s28 = sphi %s1334_s28, %s1567_s28   ;;  %s1261_s27 = sphi %s1332_s27, %s1566_s27   ;;  %s1257_s26 = sphi %s1330_s26, %s1565_s26   ;;  %s1253_s25 = sphi %s1328_s25, %s1564_s25   ;;  %s1249_s24 = sphi %s1326_s24, %s1563_s24  }
   0xc   : > { %p1360_p1 = scmp.eq.s32.totalorder %s875_s30, 0  ;;  %p222_p2 = scmp.lt.s32.totalorder %s1269_s29, 3 }
   0xd   : > { %s1555_s1 = sld [smem:[#allocation17_spill]]  ;;  %s1271_s13 = smov [#allocation7]  }
   0xe   : > { %p1368_p3 = pnand %p877_p0, %p222_p2  ;;  %s235_s14 = sshll.u32 %s1271_s13, 4  ;;  %s236_s14 = int_to_ptr.vmem [resolvable:$true] %s235_s14 }
   0xf   : > { %p881_p6 = scmp.ge.s32.totalorder %s1269_s29, 2  ;;  %s1558_s3 = sld [smem:[#allocation18_spill]] }
  0x10   : > { %p951_p4 = pneg %p1368_p3  ;;  %s1272_s19 = smov 64  }
  0x11   : > { %s1273_s20 = smov 4   ;;  %s1274_s21 = smov [#allocation9]  }
  0x12   : > { %p1376_p5 = pnand %p951_p4, %p1360_p1  ;;  %s252_s22 = sshll.u32 %s1274_s21, 4  ;;  %s253_s22 = int_to_ptr.vmem [resolvable:$true] %s252_s22 }
  0x13   : > { %s233_s11 = sshll.u32 %s1555_s1, 4  ;;  %s267_s10 = sshll.u32 %s1549_s5, 4  ;;  %s234_s11 = int_to_ptr.hbm [resolvable:$true] %s233_s11  ;;  %s268_s10 = int_to_ptr.hbm [resolvable:$true] %s267_s10 }
  0x14   : > { %954 = dma.hbm_to_vmem [thread:$0]  (!%p1376_p5), %s234_s11, 256, %s236_s14, [#allocation8], %s1272_s19, %s1272_s19, %s1273_s20  }
  0x15   : > { %s250_s18 = sshll.u32 %s1558_s3, 4  ;;  %s1275_s13 = smov [#allocation10]   ;;  %s251_s18 = int_to_ptr.hbm [resolvable:$true] %s250_s18 }
  0x16   : > { %957 = dma.hbm_to_vmem [thread:$0]  (!%p1376_p5), %s251_s18, 256, %s253_s22, [#allocation8], %s1272_s19, %s1272_s19, %s1273_s20  }
  0x17   : > { %s269_s16 = sshll.u32 %s1275_s13, 4  ;;  %s876_s11 = sadd.s32 4294967294, %s1269_s29   ;;  %s270_s16 = int_to_ptr.vmem [resolvable:$true] %s269_s16 }
  0x18   : > { %960 = dma.hbm_to_vmem [thread:$0]  (!%p1376_p5), %s268_s10, 256, %s270_s16, [#allocation11], %s1272_s19, %s1272_s19, %s1273_s20  }
  0x19   : > { %s37_s14 = sadd.s32 1, %s1265_s28  ;;  %s44_s17 = sadd.s32 1, %s1257_s26 }
  0x1a   : > { %p39_p7 = scmp.ge.s32.totalorder %s37_s14, 2  ;;  %p51_p8 = scmp.ne.s32.totalorder %s1257_s26, %s1253_s25 }
  0x1b   : > { %p52_p9 = scmp.eq.s32.totalorder %s1269_s29, 0  ;;  %p57_p10 = scmp.ne.s32.totalorder %s1253_s25, %s1249_s24 }
  0x1c   : > { %s1569_s14 = smov (%p39_p7, %s37_s14), 0  ;;  %p209_p13 = scmp.eq.s32.totalorder %s875_s30, 1 }
  0x1d   : > { %p1403_p11 = por %p52_p9, %p51_p8  ;;  %p1409_p12 = por %p1360_p1, %p57_p10 }
  0x1e   : > { %s41_s19 = ssub.s32 %s1265_s28, %s1569_s14  ;;  %p215_p2 = scmp.eq.s32.totalorder %s876_s11, 1 }
  0x1f   : > { %p42_p0 = scmp.eq.s32.totalorder %s41_s19, 0  ;;  %p1417_p4 = por %p209_p13, %p51_p8 }
  0x20   : > { %p972_p5 = scmp.lt.s32.totalorder %s1269_s29, 2  ;;  %p1425_p7 = por %p215_p2, %p57_p10 }
  0x21   : > { %s1423_s21 = scalar_select %p42_p0, %s1257_s26, %s44_s17  }
  0x22   : > { %s286_s23 = sand.u32 1, %s1257_s26   ;;  %s883_s10 = sshll.u32 %s1265_s28, 2 }
  0x23   : > { %s882_s9 = sshll.u32 %s286_s23, 2  ;;  %s294_s30 = scalar_lea.hbm %s1544_s0, %s883_s10 }
  0x24   : > { %s290_s19 = scalar_lea.vmem [#allocation4], %s882_s9  ;;  %s296_s1 = sshll.u32 %s294_s30, 4  ;;  %s297_s1 = int_to_ptr.hbm [resolvable:$true] %s296_s1 }
  0x25   : > { %s298_s11 = sshll.u32 %s290_s19, 4  ;;  %p962_p8 = pnand %p972_p5, %p1403_p11  ;;  %s299_s11 = int_to_ptr.vmem [resolvable:$true] %s298_s11 }
  0x26   : > { %s287_s17 = scalar_lea.sflag [#allocation5], %s286_s23  ;;  %307 = sbr.rel (%p1368_p3) target bundleno = 1160 (0x488), region = 48 }
  0x27   : > { %964 = dma.hbm_to_vmem [thread:$0]  (!%p962_p8), %s297_s1, 64, %s299_s11, %s287_s17  }
  0x28   : > { %s1439_s3 = sand.u32 (!%p1368_p3), 1, %s1253_s25  }
  0x29   : > { %s885_s13 = sshll.u32 (!%p1368_p3), %s1439_s3, 2  ;;  %s310_s10 = scalar_lea.sflag (!%p1368_p3), [#allocation5], %s1439_s3 }
  0x2a   : > { %s313_s9 = scalar_lea.vmem (!%p1368_p3), [#allocation4], %s885_s13 }
  0x2b   : > { %1232 = dma.done.wait (%p1409_p12), %s310_s10, 64  }
  0x2c   : > { %1234 = vsyncadd (%p1409_p12), %s310_s10, 4294967232 }
  0x2d   : > { %1236 = dma.done.wait (%p1360_p1), [#allocation8], 512  }
  0x2e   : > { %1238 = vsyncadd (%p1360_p1), [#allocation8], 4294966784 }
  0x2f   : > { %1240 = dma.done.wait (%p1360_p1), [#allocation11], 256  }
  0x30   : > { %1242 = vsyncadd (%p1360_p1), [#allocation11], 4294967040  ;;  %v930_v0 = vld [vmem:[#allocation9 + $0x8] sm:$0xff]  ;;  %v932_v1 = vld [vmem:[#allocation7 + $0x8] sm:$0xff]  ;;  %vm386_vm0 = vcmask 261120   ;;  %vm404_vm1 = vcmask 519168  }
  0x31   : > { %396 = vmatpush.bf16.msra.mxu0 %v930_v0  ;;  %v929_v2 = vld [vmem:[#allocation9] sm:$0xff]  ;;  %442 = vmatpush.bf16.msra.mxu1 %v932_v1  ;;  %v931_v3 = vld [vmem:[#allocation7] sm:$0xff]  ;;  %v365_v4 = vld [vmem:[%s313_s9] sm:$0xf]  ;;  %vm451_vm2 = vcmask 64512   ;;  %s1276_s15 = smov 112  }
  0x32   : > { %v411_v5 = vld [vmem:[%s313_s9] sm:$0xf]  ;;  %v1040_v6 = vld [vmem:[%s1548_s4] ss:$0 sm:$0xff]  ;;  %s1277_s23 = smov 120   ;;  %s1278_s16 = smov 104  }
  0x33   : > { %v1041_v11 = vld [vmem:[%s1546_s2] ss:$0 sm:$0xff]  ;;  %s1279_s30 = smov 96   ;;  %s1280_s19 = smov 88   ;;  %vm489_vm3 = vcmask 1043456   ;;  %vm701_vm4 = vcmask 130048  }
  0x34   : > { %s1281_s11 = smov 80   ;;  %s1282_s17 = smov 72   ;;  %vm704_vm5 = vcmask 195584   ;;  %vm708_vm6 = vcmask 257024  }
  0x35   : > { %397 = vmatpush.bf16.msra.mxu0 %v929_v2  ;;  %443 = vmatpush.bf16.msra.mxu1 %v931_v3  ;;  %s1283_s13 = smov 16   ;;  %s1284_s10 = smov 8  }
  0x36   : > { %s1285_s9 = smov 24   ;;  %s926_s1 = sshll.u32 %s1261_s27, 3 }
  0x37   : > { %s889_s12 = sshll.u32 %s1439_s3, 3  ;;  %s749_s27 = scalar_lea.sflag [#allocation6], %s1439_s3 }
  0x38   : > { %898 = vmatmul.msk.bf16.vlgmr.msra.gmra.mxu0 %vm386_vm0, %v365_v4  ;;  %907 = vmatmul.msk.bf16.vlgmr.msra.gmra.mxu1 %vm386_vm0, %v411_v5 }
  0xb5   : > { %v399_v7 = vpop.f32.mrf.mxu0  ;;  %v445_v9 = vpop.f32.mrf.mxu1 }
  0xb6   : > { %v400_v8 = vadd.f32 %v1040_v6, %v399_v7  ;;  %v446_v13 = vadd.f32 %v1041_v11, %v445_v9 }
  0xb8   : > { %v403_v10 = vpack.c.bf16 %v400_v8, %v400_v8  ;;  %v449_v16 = vpack.c.bf16 %v446_v13, %v446_v13 }
  0xba   : > { %405 = vst.msk [vmem:[#allocation2] sm:$0xf] %vm404_vm1, %v403_v10  ;;  %v510_v20 = vunpack.c.l.b16 %v449_v16 }
  0xbc   : > { %v511_v21 = vpack.c.b16 %v510_v20, %v510_v20 }
  0xbd   : > { %v401_v12 = vpop.f32.mrf.mxu0  ;;  %v447_v14 = vpop.f32.mrf.mxu1 }
  0xc1   : > { %v450_v15 = vld [vmem:[#allocation2] sm:$0xf] }
  0xc2   : > { %v456_v17 = vsel %vm451_vm2, %v450_v15, 0  ;;  %v482_v18 = vunpack.c.l.b16 %v450_v15 }
  0xc3   : > { %465 = vmatpush.bf16.xpose.msra.mxu2 %v456_v17 }
  0xc4   : > { %v1464_v19 = vpack.c.b16 %v482_v18, %v482_v18 }
  0xc6   : > { %571 = vrot.lane.b32.xlu2 %v1464_v19, %s1276_s15  ;;  %514 = vrot.lane.b32.xlu1 %v1464_v19, %s1277_s23 }
  0xca   : > { %908 = vmatmul.msk.bf16.vlgmr.msra.gmra.mxu2 %vm451_vm2, %v449_v16 }
  0xce   : > { %628 = vrot.lane.b32.xlu2 %v1464_v19, %s1278_s16  ;;  %512 = vrot.lane.b32.xlu1 %v511_v21, %s1277_s23 }
  0xd6   : > { %626 = vrot.lane.b32.xlu2 %v511_v21, %s1278_s16  ;;  %569 = vrot.lane.b32.xlu1 %v511_v21, %s1276_s15  ;;  %s760_s15 = scalar_lea.hbm %s1551_s7, %s926_s1  ;;  %s1199_s1 = scalar_lea.hbm %s1551_s7, 16 }
 0x120   : > { %v572_v22 = vpop.permute.xlu2 %571 }
 0x121   : > { %v577_v23 = vsel %vm451_vm2, %v572_v22, 0 }
 0x122   : > { %586 = vmatpush.bf16.xpose.msrb.mxu1 %v577_v23 }
 0x128   : > { %v629_v39 = vpop.permute.xlu2 %628 }
 0x129   : > { %v634_v42 = vsel %vm451_vm2, %v629_v39, 0 }
 0x130   : > { %v627_v45 = vpop.permute.xlu2 %626 }
 0x138   : > { %v515_v24 = vpop.permute.xlu1 %514 }
 0x139   : > { %v520_v40 = vsel %vm451_vm2, %v515_v24, 0 }
 0x140   : > { %v513_v25 = vpop.permute.xlu1 %512 }
 0x148   : > { %v570_v26 = vpop.permute.xlu1 %569 }
 0x149   : > { %912 = vmatmul.msk.bf16.vlgmr.msrb.gmra.mxu1 %vm451_vm2, %v570_v26 }
 0x14d   : > { %v467_v27 = vpop.f32.mrf.mxu2 }
 0x14e   : > { %v471_v28 = vsel %vm451_vm2, %v467_v27, -inf }
 0x14f   : > { %472 = vmax.xlane.f32.xlu0 %v471_v28 }
 0x155   : > { %v469_v29 = vpop.f32.mrf.mxu2 }
 0x163   : > { %484 = vrot.lane.b32.xlu0 %v1464_v19, %s1279_s30  ;;  %s359_s30 = scalar_lea.vmem [#allocation12], %s889_s12 }
 0x16b   : > { %545 = vrot.lane.b32.xlu0 %v1464_v19, %s1280_s19  ;;  %s762_s19 = sshll.u32 %s359_s30, 4  ;;  %s763_s19 = int_to_ptr.vmem [resolvable:$true] %s762_s19 }
 0x1c2   : > { %v473_v30 = vpop.xlane.xlu0 %472 }
 0x1c3   : > { %v474_v32 = vsub.f32 %v467_v27, %v473_v30 }
 0x1c5   : > { %v475_v34 = vmul.f32 1.442695, %v474_v32 }
 0x1c6   : > { %v588_v31 = vpop.f32.mrf.mxu1 }
 0x1c7   : > { %v592_v33 = vsel %vm451_vm2, %v588_v31, -inf  ;;  %1043 = vpow2.f32 %v475_v34 }
 0x1c8   : > { %593 = vmax.xlane.f32.xlu2 %v592_v33 }
 0x1cd   : > { %v1044_v36 = vpop.eup %1043 }
 0x1ce   : > { %v590_v35 = vpop.f32.mrf.mxu1  ;;  %v480_v41 = vpack.c.bf16 %v1044_v36, %v1044_v36  ;;  %v477_v62 = vsel %vm451_vm2, %v1044_v36, 0.0 }
 0x1d5   : > { %v485_v37 = vpop.permute.xlu0 %484 }
 0x1d6   : > { %v491_v38 = vsel %vm489_vm3, %v485_v37, 0  ;;  %v934_v37 = vld [vmem:[#allocation10 + $0x8] sm:$0xff] }
 0x1d7   : > { %500 = vmatpush.bf16.msra.mxu3 %v491_v38  ;;  %740 = vmatpush.bf16.msra.mxu1 %v934_v37  ;;  %v933_v38 = vld [vmem:[#allocation10] sm:$0xff] }
 0x1da   : > { %909 = vmatmul.msk.bf16.vlgmr.msra.gmra.mxu3 %vm451_vm2, %v480_v41 }
 0x1db   : > { %529 = vmatpush.bf16.xpose.msrb.mxu3 %v520_v40  ;;  %741 = vmatpush.bf16.msra.mxu1 %v933_v38 }
 0x1dd   : > { %v546_v43 = vpop.permute.xlu0 %545 }
 0x1de   : > { %v551_v44 = vsel %vm489_vm3, %v546_v43, 0 }
 0x1df   : > { %560 = vmatpush.bf16.msrb.mxu0 %v551_v44 }
 0x1e0   : > { %602 = vrot.lane.b32.xlu2 %v1464_v19, %s1281_s11  ;;  %s764_s11 = sshll.u32 %s760_s15, 4  ;;  %s765_s11 = int_to_ptr.hbm [resolvable:$true] %s764_s11 }
 0x1e3   : > { %643 = vmatpush.bf16.xpose.msra.mxu3 %v634_v42 }
 0x1ea   : > { %910 = vmatmul.msk.bf16.vlgmr.msrb.gmra.mxu3 %vm451_vm2, %v513_v25 }
 0x1fa   : > { %914 = vmatmul.msk.bf16.vlgmr.msra.gmra.mxu3 %vm451_vm2, %v627_v45 }
 0x23b   : > { %v594_v46 = vpop.xlane.xlu2 %593 }
 0x23c   : > { %v595_v47 = vsub.f32 %v588_v31, %v594_v46 }
 0x23e   : > { %v596_v48 = vmul.f32 1.442695, %v595_v47 }
 0x240   : > { %1045 = vpow2.f32 %v596_v48 }
 0x243   : > { %v603_v49 = vpop.permute.xlu2 %602 }
 0x244   : > { %v608_v50 = vsel %vm489_vm3, %v603_v49, 0 }
 0x245   : > { %617 = vmatpush.bf16.msrb.mxu2 %v608_v50  ;;  %v1042_v50 = vld [vmem:[%s1550_s6] ss:$0 sm:$0xff] }
 0x246   : > { %v1046_v51 = vpop.eup %1045 }
 0x247   : > { %v601_v52 = vpack.c.bf16 %v1046_v51, %v1046_v51  ;;  %v598_v61 = vsel %vm451_vm2, %v1046_v51, 0.0 }
 0x249   : > { %913 = vmatmul.msk.bf16.vlgmr.msrb.gmra.mxu2 %vm451_vm2, %v601_v52 }
 0x25d   : > { %v1486_v53 = vpop.f32.mrf.mxu3 }
 0x265   : > { %v504_v54 = vpop.f32.mrf.mxu3 }
 0x26d   : > { %v531_v55 = vpop.f32.mrf.mxu3 }
 0x26e   : > { %v535_v56 = vsel %vm451_vm2, %v531_v55, -inf }
 0x26f   : > { %536 = vmax.xlane.f32.xlu1 %v535_v56 }
 0x275   : > { %v533_v57 = vpop.f32.mrf.mxu3 }
 0x27d   : > { %v645_v58 = vpop.f32.mrf.mxu3 }
 0x27e   : > { %v649_v59 = vsel %vm451_vm2, %v645_v58, -inf }
 0x27f   : > { %650 = vmax.xlane.f32.xlu0 %v649_v59 }
 0x285   : > { %v647_v60 = vpop.f32.mrf.mxu3 }
 0x287   : > { %599 = vadd.xlane.f32.xlu0 %v598_v61 }
 0x288   : > { %659 = vrot.lane.b32.xlu1 %v1464_v19, %s1282_s17  ;;  %s1193_s17 = sshra.s32 %s765_s11, 4  ;;  %s1194_s17 = int_to_ptr.hbm [resolvable:$true] %s1193_s17 }
 0x289   : > { %p1200_p10 = scmp.lt.s32.totalorder %s1194_s17, %s1551_s7 }
 0x2b2   : > { %478 = vadd.xlane.f32.xlu1 %v477_v62 }
 0x2cc   : > { %v619_v63 = vpop.f32.mrf.mxu2 }
 0x2d4   : > { %v621_v0 = vpop.f32.mrf.mxu2 }
 0x2e2   : > { %v537_v1 = vpop.xlane.xlu1 %536 }
 0x2e3   : > { %v538_v2 = vsub.f32 %v531_v55, %v537_v1 }
 0x2e5   : > { %v539_v3 = vmul.f32 1.442695, %v538_v2 }
 0x2e7   : > { %1047 = vpow2.f32 %v539_v3 }
 0x2ed   : > { %v1048_v4 = vpop.eup %1047 }
 0x2ee   : > { %v541_v5 = vsel %vm451_vm2, %v1048_v4, 0.0  ;;  %v544_v6 = vpack.c.bf16 %v1048_v4, %v1048_v4 }
 0x2ef   : > { %542 = vadd.xlane.f32.xlu0 %v541_v5 }
 0x2f0   : > { %911 = vmatmul.msk.bf16.vlgmr.msrb.gmra.mxu0 %vm451_vm2, %v544_v6 }
 0x2f2   : > { %v651_v7 = vpop.xlane.xlu0 %650 }
 0x2f3   : > { %v652_v8 = vsub.f32 %v645_v58, %v651_v7 }
 0x2f5   : > { %v653_v9 = vmul.f32 1.442695, %v652_v8 }
 0x2f7   : > { %1049 = vpow2.f32 %v653_v9 }
 0x2fa   : > { %v660_v10 = vpop.permute.xlu1 %659  ;;  %v600_v11 = vpop.xlane.xlu0 %599 }
 0x2fb   : > { %v665_v12 = vsel %vm489_vm3, %v660_v10, 0  ;;  %1051 = vrcp.f32 %v600_v11 }
 0x2fc   : > { %674 = vmatpush.bf16.msra.mxu0 %v665_v12 }
 0x2fd   : > { %v1050_v13 = vpop.eup %1049 }
 0x2fe   : > { %v658_v14 = vpack.c.bf16 %v1050_v13, %v1050_v13  ;;  %v655_v15 = vsel %vm451_vm2, %v1050_v13, 0.0 }
 0x2ff   : > { %656 = vadd.xlane.f32.xlu2 %v655_v15 }
 0x300   : > { %915 = vmatmul.msk.bf16.vlgmr.msra.gmra.mxu0 %vm451_vm2, %v658_v14 }
 0x301   : > { %v1052_v16 = vpop.eup %1051 }
 0x302   : > { %v624_v17 = vmul.f32 %v1052_v16, %v619_v63 }
 0x304   : > { %v625_v18 = vpack.c.bf16 %v624_v17, %v624_v17 }
 0x306   : > { %v689_v19 = vunpack.c.l.b16 %v625_v18 }
 0x308   : > { %v690_v20 = vpack.c.b16 %v689_v19, %v689_v19 }
 0x30a   : > { %691 = vrot.lane.b32.xlu0 %v690_v20, %s1283_s13  ;;  %s1195_s13 = scalar_lea.hbm %s1194_s17, 8 }
 0x30b   : > { %p1196_p1 = scmp.ne.s32.totalorder %s1194_s17, %s1195_s13  ;;  %p1201_p11 = scmp.lt.s32.totalorder %s1199_s1, %s1195_s13 }
 0x30d   : > { %p1197_p3 = pnand %p1196_p1, %p1417_p4  ;;  %p1202_p12 = por %p1201_p11, %p1200_p10 }
 0x30f   : > { %p1198_p9 = pneg %p1197_p3 }
 0x311   : > { %p1203_p13 = pnand %p1202_p12, %p1198_p9 }
 0x325   : > { %v479_v39 = vpop.xlane.xlu1 %478 }
 0x362   : > { %v543_v21 = vpop.xlane.xlu0 %542 }
 0x363   : > { %1053 = vrcp.f32 %v543_v21 }
 0x369   : > { %v1054_v22 = vpop.eup %1053 }
 0x36d   : > { %v562_v23 = vpop.f32.mrf.mxu0 }
 0x36e   : > { %v567_v24 = vmul.f32 %v1054_v22, %v562_v23 }
 0x370   : > { %v568_v25 = vpack.c.bf16 %v567_v24, %v567_v24 }
 0x372   : > { %v684_v26 = vunpack.c.l.b16 %v568_v25  ;;  %v657_v28 = vpop.xlane.xlu2 %656 }
 0x373   : > { %1055 = vrcp.f32 %v657_v28 }
 0x374   : > { %v685_v27 = vpack.c.b16 %v684_v26, %v684_v26  ;;  %1057 = vrcp.f32 %v479_v39 }
 0x375   : > { %v564_v29 = vpop.f32.mrf.mxu0 }
 0x376   : > { %686 = vrot.lane.b32.xlu0 %v685_v27, %s1284_s10 }
 0x379   : > { %v1056_v30 = vpop.eup %1055 }
 0x37a   : > { %v1058_v41 = vpop.eup %1057 }
 0x37b   : > { %v507_v42 = vmul.f32 %v1058_v41, %v1486_v53 }
 0x37c   : > { %v692_v40 = vpop.permute.xlu0 %691 }
 0x37d   : > { %v676_v31 = vpop.f32.mrf.mxu0  ;;  %v508_v44 = vpack.c.bf16 %v507_v42, %v507_v42 }
 0x37e   : > { %v681_v32 = vmul.f32 %v1056_v30, %v676_v31 }
 0x380   : > { %v682_v33 = vpack.c.bf16 %v681_v32, %v681_v32 }
 0x382   : > { %v694_v34 = vunpack.c.l.b16 %v682_v33 }
 0x384   : > { %v695_v35 = vpack.c.b16 %v694_v34, %v694_v34 }
 0x385   : > { %v678_v36 = vpop.f32.mrf.mxu0 }
 0x386   : > { %696 = vrot.lane.b32.xlu0 %v695_v35, %s1285_s9 }
 0x3e8   : > { %v687_v43 = vpop.permute.xlu0 %686 }
 0x3e9   : > { %v700_v45 = vsel %vm451_vm2, %v508_v44, %v687_v43 }
 0x3ea   : > { %v703_v46 = vsel %vm701_vm4, %v700_v45, %v692_v40 }
 0x3f8   : > { %v697_v47 = vpop.permute.xlu0 %696 }
 0x3f9   : > { %v706_v48 = vsel %vm704_vm5, %v703_v46, %v697_v47 }
 0x3fa   : > { %709 = vst.msk [vmem:[#allocation3] sm:$0xf] %vm708_vm6, %v706_v48 }
 0x401   : > { %v710_v49 = vld [vmem:[#allocation3] sm:$0xf] }
 0x402   : > { %924 = vmatmul.msk.bf16.vlgmr.msra.gmra.mxu1 %vm386_vm0, %v710_v49 }
 0x47f   : > { %v743_v51 = vpop.f32.mrf.mxu1 }
 0x480   : > { %v744_v52 = vadd.f32 %v1042_v50, %v743_v51 }
 0x482   : > { %747 = vst.msk [vmem:[%s359_s30] sm:$0xff] %vm386_vm0, %v744_v52 }
 0x483   : > { %1206 = shalt.err (!%p1203_p13)
}
 0x484   : > { %949 = dma.vmem_to_hbm [thread:$0]  (%p1417_p4), %s763_s19, 128, %s765_s11, %s749_s27  }
 0x487   : > { %v745_v53 = vpop.f32.mrf.mxu1 }
 0x488 PF: > { %s776_s3 = sand.u32 1, %s1249_s24   ;;  %p966_p0 = pnand %p881_p6, %p1425_p7 }
 0x489   : > { %s777_s18 = scalar_lea.sflag [#allocation6], %s776_s3 }
 0x48a   : > { %p967_p2 = pneg %p966_p0 }
 0x48c   : > { %1244 = dma.done.wait (%p967_p2), %s777_s18, 128  }
 0x48d   : > { %1246 = vsyncadd (%p967_p2), %s777_s18, 4294967168  ;;  %s25_s29 = sadd.s32 1, %s1269_s29   ;;  %s1563_s24 = smov %s1253_s25 }
 0x48e   : > { %p22_p5 = scmp.ge.s32.totalorder %s25_s29, 4   ;;  %s1564_s25 = smov %s1257_s26 }
 0x48f   : > { %s1565_s26 = smov %s1423_s21  ;;  %s1566_s27 = smov %s1265_s28 }
 0x490   : > { %s1567_s28 = smov %s1569_s14  ;;  %24 = sbr.rel (!%p22_p5) target bundleno = 11 (0xb), region = 110 }
 0x495   :  { %783 = vsyncpa [#allocation5], 1 }
 0x496   :  { %785 = vsyncpa [#allocation5 + $0x1], 1 }
 0x497   :  { %786 = vsyncpa [#allocation8], 1 }
 0x498   :  { %787 = vsyncpa [#allocation11], 1 }
 0x499   :  { %788 = vsyncpa [#allocation6], 1 }
 0x49a   :  { %790 = vsyncpa [#allocation6 + $0x1], 1 }

</bundles_post_ra>
